<compile_context>
chip_gen: v7x
topology: tpu7x:2x2x1
jax: 0.10.0
libtpu: 0.0.40
codegen_flags: <defaults>
</compile_context>

<pallas_src>
from functools import partial

import jax
import jax.numpy as jnp
from jax.experimental import pallas as pl
from jax.experimental.pallas import tpu as pltpu


# ------------------------------ fused kernel ------------------------------- #

def _fused_attention_kernel(x_ref, qkv_w_ref, qkv_b_ref, proj_w_ref, proj_b_ref,
                            o_ref, *, n_heads, scale):
    # x_ref: (1, N, C) block for one batch element; weights are full-array VMEM residents.
    _, N, C = x_ref.shape
    D = C // n_heads

    x = x_ref[0]                                                         # (N, C)

    # qkv projection: (N, C) @ (C, 3C) + (1, 3C)   -- single wide MXU matmul
    qkv = jnp.dot(x, qkv_w_ref[...], preferred_element_type=jnp.float32)
    qkv = qkv + qkv_b_ref[...]                                           # (N, 3C)

    # Column layout of qkv matches torch.reshape(B, N, 3, H, D):
    #   [ q_h0 .. q_h{H-1} | k_h0 .. k_h{H-1} | v_h0 .. v_h{H-1} ], each head block D wide.
    head_outs = []
    for h in range(n_heads):                 # statically unrolled, all in-register/VMEM
        q_h = qkv[:, h * D:(h + 1) * D] * scale                          # (N, D), scale on q
        k_h = qkv[:, C + h * D:C + (h + 1) * D]                          # (N, D)
        v_h = qkv[:, 2 * C + h * D:2 * C + (h + 1) * D]                  # (N, D)

        # q @ k^T without materializing k.T: contract last dim of both operands.
        s = jax.lax.dot_general(q_h, k_h, (((1,), (1,)), ((), ())),
                                preferred_element_type=jnp.float32)      # (N, N)

        # numerically stable softmax (f32); divide via EUP reciprocal
        s = s - jnp.max(s, axis=-1, keepdims=True)
        p = jnp.exp(s)
        p = p * pl.reciprocal(jnp.sum(p, axis=-1, keepdims=True), approx=True)

        # attn_drop is p=0.0 -> identity
        head_outs.append(jnp.dot(p, v_h, preferred_element_type=jnp.float32))  # (N, D)

    # merge heads lane-dense: (N, C) -- no wrapper-side transpose needed
    o = jnp.concatenate(head_outs, axis=-1)                              # (N, C)

    # output projection (proj_drop p=0.0 -> identity)
    out = jnp.dot(o, proj_w_ref[...], preferred_element_type=jnp.float32)
    out = out + proj_b_ref[...]                                          # (N, C)
    o_ref[0] = out.astype(o_ref.dtype)


# ------------------------------ module forward ----------------------------- #

def attention_forward(x, params, n_heads):
    """Pallas equivalent of Attention.forward.  x: (B, N, C) float32."""
    B, N, C = x.shape
    D = C // n_heads
    scale = D ** (-0.5)

    kernel = partial(_fused_attention_kernel, n_heads=n_heads, scale=scale)

    return pl.pallas_call(
        kernel,
        out_shape=jax.ShapeDtypeStruct((B, N, C), x.dtype),
        grid=(B,),
        in_specs=[
            pl.BlockSpec((1, N, C), lambda b: (b, 0, 0)),       # x: one batch per step
            pl.BlockSpec((C, 3 * C), lambda b: (0, 0)),         # qkv_w (resident)
            pl.BlockSpec((1, 3 * C), lambda b: (0, 0)),         # qkv_b (resident)
            pl.BlockSpec((C, C), lambda b: (0, 0)),             # proj_w (resident)
            pl.BlockSpec((1, C), lambda b: (0, 0)),             # proj_b (resident)
        ],
        out_specs=pl.BlockSpec((1, N, C), lambda b: (b, 0, 0)),
        compiler_params=pltpu.CompilerParams(
            dimension_semantics=("parallel",),                  # batch axis -> 2 TCs on v7x
        ),
    )(
        x,
        params["qkv_w"],
        params["qkv_b"].reshape(1, 3 * C),
        params["proj_w"],
        params["proj_b"].reshape(1, C),
    )


# ------------------------------- reference --------------------------------- #

def attention_reference(x, params, n_heads):
    B, N, C = x.shape
    D = C // n_heads
    scale = D ** (-0.5)
    qkv = x @ params["qkv_w"] + params["qkv_b"]
    qkv = qkv.reshape(B, N, 3, n_heads, D).transpose(2, 0, 3, 1, 4)
    q, k, v = qkv[0], qkv[1], qkv[2]
    attn = jnp.einsum("bhnd,bhmd->bhnm", q, k) * scale
    attn = jax.nn.softmax(attn, axis=-1)
    o = jnp.einsum("bhnm,bhmd->bhnd", attn, v)
    o = o.transpose(0, 2, 1, 3).reshape(B, N, C)
    return o @ params["proj_w"] + params["proj_b"]


# --------------------------------- main ------------------------------------ #

def init_params(key, dim):
    # Linear weights stored as (in_features, out_features): y = x @ W + b,
    # equivalent to PyTorch's y = x @ weight.T + bias.
    k1, k2, k3, k4 = jax.random.split(key, 4)
    return {
        "qkv_w": 0.02 * jax.random.normal(k1, (dim, 3 * dim), jnp.float32),
        "qkv_b": 0.02 * jax.random.normal(k2, (3 * dim,), jnp.float32),
        "proj_w": 0.02 * jax.random.normal(k3, (dim, dim), jnp.float32),
        "proj_b": 0.02 * jax.random.normal(k4, (dim,), jnp.float32),
    }


if __name__ == "__main__":
    B, N, dim, n_heads = 2, 16, 96, 12   # head_dim = 8

    key = jax.random.PRNGKey(0)
    kx, kp = jax.random.split(key)
    x = jax.random.normal(kx, (B, N, dim), jnp.float32)
    params = init_params(kp, dim)

    out = attention_forward(x, params, n_heads)
    out = jax.block_until_ready(out)

    ref = attention_reference(x, params, n_heads)
    assert out.shape == (B, N, dim)
    # Tolerance loosened slightly (1e-3) because the softmax denominator uses the
    # EUP approximate reciprocal (pl.reciprocal(approx=True)); all other math is f32.
    assert jnp.allclose(out, ref, atol=1e-3, rtol=1e-3), "mismatch vs reference"

    print("KERNEL_OK")
</pallas_src>

<mosaic_0001>
module attributes {stable_mosaic.version = 11 : i64} {
  func.func @_fused_attention_kernel(%arg0: i32, %arg1: memref<1x16x96xf32, #tpu.memory_space<vmem>>, %arg2: memref<96x288xf32, #tpu.memory_space<vmem>>, %arg3: memref<1x288xf32, #tpu.memory_space<vmem>>, %arg4: memref<96x96xf32, #tpu.memory_space<vmem>>, %arg5: memref<1x96xf32, #tpu.memory_space<vmem>>, %arg6: memref<1x16x96xf32, #tpu.memory_space<vmem>>) attributes {dimension_semantics = [#tpu.dimension_semantics<parallel>], iteration_bounds = array<i64: 2>, scalar_prefetch = 0 : i64, scratch_operands = 0 : i64, tpu.core_type = #tpu.core_type<tc>, window_params = [{transform_indices = @transform_0, window_bounds = array<i64: 1, 16, 96>}, {pipeline_mode = #tpu.pipeline_mode<synchronous>, transform_indices = @transform_1, window_bounds = array<i64: 96, 288>}, {pipeline_mode = #tpu.pipeline_mode<synchronous>, transform_indices = @transform_2, window_bounds = array<i64: 1, 288>}, {pipeline_mode = #tpu.pipeline_mode<synchronous>, transform_indices = @transform_3, window_bounds = array<i64: 96, 96>}, {pipeline_mode = #tpu.pipeline_mode<synchronous>, transform_indices = @transform_4, window_bounds = array<i64: 1, 96>}, {transform_indices = @transform_5, window_bounds = array<i64: 1, 16, 96>}]} {
    %c0 = arith.constant 0 : index
    %c0_0 = arith.constant 0 : index
    %c0_1 = arith.constant 0 : index
    %0 = vector.load %arg1[%c0, %c0_0, %c0_1] : memref<1x16x96xf32, #tpu.memory_space<vmem>>, vector<1x16x96xf32>
    %1 = vector.shape_cast %0 : vector<1x16x96xf32> to vector<16x96xf32>
    %c0_2 = arith.constant 0 : index
    %c0_3 = arith.constant 0 : index
    %2 = vector.load %arg2[%c0_2, %c0_3] : memref<96x288xf32, #tpu.memory_space<vmem>>, vector<96x288xf32>
    %cst = arith.constant dense<0.000000e+00> : vector<16x288xf32>
    %3 = tpu.matmul %1, %2, %cst {dimension_numbers = #tpu.dot_dimension_numbers<[1], [0], [0], [1], [0, 0, 1, 1], [], []>} : vector<16x96xf32>, vector<96x288xf32>, vector<16x288xf32> -> vector<16x288xf32>
    %c0_4 = arith.constant 0 : index
    %c0_5 = arith.constant 0 : index
    %4 = vector.load %arg3[%c0_4, %c0_5] : memref<1x288xf32, #tpu.memory_space<vmem>>, vector<1x288xf32>
    %5 = vector.broadcast %4 : vector<1x288xf32> to vector<16x288xf32>
    %6 = arith.addf %3, %5 : vector<16x288xf32>
    %7 = vector.extract_strided_slice %6 {offsets = [0, 0], sizes = [16, 8], strides = [1, 1]} : vector<16x288xf32> to vector<16x8xf32>
    %cst_6 = arith.constant 0.353553385 : f32
    %8 = vector.broadcast %cst_6 : f32 to vector<16x8xf32>
    %9 = arith.mulf %7, %8 : vector<16x8xf32>
    %10 = vector.extract_strided_slice %6 {offsets = [0, 96], sizes = [16, 8], strides = [1, 1]} : vector<16x288xf32> to vector<16x8xf32>
    %11 = vector.extract_strided_slice %6 {offsets = [0, 192], sizes = [16, 8], strides = [1, 1]} : vector<16x288xf32> to vector<16x8xf32>
    %cst_7 = arith.constant dense<0.000000e+00> : vector<16x16xf32>
    %12 = tpu.matmul %9, %10, %cst_7 {dimension_numbers = #tpu.dot_dimension_numbers<[1], [1], [0], [0], [0, 0, 1, 0], [], []>} : vector<16x8xf32>, vector<16x8xf32>, vector<16x16xf32> -> vector<16x16xf32>
    %cst_8 = arith.constant dense<0xFF800000> : vector<16xf32>
    %13 = vector.multi_reduction <maximumf>, %12, %cst_8 [1] : vector<16x16xf32> to vector<16xf32>
    %14 = vector.shape_cast %13 : vector<16xf32> to vector<16x1xf32>
    %15 = vector.broadcast %14 : vector<16x1xf32> to vector<16x16xf32>
    %16 = arith.subf %12, %15 : vector<16x16xf32>
    %17 = math.exp %16 : vector<16x16xf32>
    %cst_9 = arith.constant dense<0.000000e+00> : vector<16xf32>
    %18 = vector.multi_reduction <add>, %17, %cst_9 [1] : vector<16x16xf32> to vector<16xf32>
    %19 = vector.shape_cast %18 : vector<16xf32> to vector<16x1xf32>
    %20 = tpu.reciprocal %19 {approx = true} : vector<16x1xf32> -> vector<16x1xf32>
    %21 = vector.broadcast %20 : vector<16x1xf32> to vector<16x16xf32>
    %22 = arith.mulf %17, %21 : vector<16x16xf32>
    %cst_10 = arith.constant dense<0.000000e+00> : vector<16x8xf32>
    %23 = tpu.matmul %22, %11, %cst_10 {dimension_numbers = #tpu.dot_dimension_numbers<[1], [0], [0], [1], [0, 0, 1, 1], [], []>} : vector<16x16xf32>, vector<16x8xf32>, vector<16x8xf32> -> vector<16x8xf32>
    %24 = vector.extract_strided_slice %6 {offsets = [0, 8], sizes = [16, 8], strides = [1, 1]} : vector<16x288xf32> to vector<16x8xf32>
    %cst_11 = arith.constant 0.353553385 : f32
    %25 = vector.broadcast %cst_11 : f32 to vector<16x8xf32>
    %26 = arith.mulf %24, %25 : vector<16x8xf32>
    %27 = vector.extract_strided_slice %6 {offsets = [0, 104], sizes = [16, 8], strides = [1, 1]} : vector<16x288xf32> to vector<16x8xf32>
    %28 = vector.extract_strided_slice %6 {offsets = [0, 200], sizes = [16, 8], strides = [1, 1]} : vector<16x288xf32> to vector<16x8xf32>
    %cst_12 = arith.constant dense<0.000000e+00> : vector<16x16xf32>
    %29 = tpu.matmul %26, %27, %cst_12 {dimension_numbers = #tpu.dot_dimension_numbers<[1], [1], [0], [0], [0, 0, 1, 0], [], []>} : vector<16x8xf32>, vector<16x8xf32>, vector<16x16xf32> -> vector<16x16xf32>
    %cst_13 = arith.constant dense<0xFF800000> : vector<16xf32>
    %30 = vector.multi_reduction <maximumf>, %29, %cst_13 [1] : vector<16x16xf32> to vector<16xf32>
    %31 = vector.shape_cast %30 : vector<16xf32> to vector<16x1xf32>
    %32 = vector.broadcast %31 : vector<16x1xf32> to vector<16x16xf32>
    %33 = arith.subf %29, %32 : vector<16x16xf32>
    %34 = math.exp %33 : vector<16x16xf32>
    %cst_14 = arith.constant dense<0.000000e+00> : vector<16xf32>
    %35 = vector.multi_reduction <add>, %34, %cst_14 [1] : vector<16x16xf32> to vector<16xf32>
    %36 = vector.shape_cast %35 : vector<16xf32> to vector<16x1xf32>
    %37 = tpu.reciprocal %36 {approx = true} : vector<16x1xf32> -> vector<16x1xf32>
    %38 = vector.broadcast %37 : vector<16x1xf32> to vector<16x16xf32>
    %39 = arith.mulf %34, %38 : vector<16x16xf32>
    %cst_15 = arith.constant dense<0.000000e+00> : vector<16x8xf32>
    %40 = tpu.matmul %39, %28, %cst_15 {dimension_numbers = #tpu.dot_dimension_numbers<[1], [0], [0], [1], [0, 0, 1, 1], [], []>} : vector<16x16xf32>, vector<16x8xf32>, vector<16x8xf32> -> vector<16x8xf32>
    %41 = vector.extract_strided_slice %6 {offsets = [0, 16], sizes = [16, 8], strides = [1, 1]} : vector<16x288xf32> to vector<16x8xf32>
    %cst_16 = arith.constant 0.353553385 : f32
    %42 = vector.broadcast %cst_16 : f32 to vector<16x8xf32>
    %43 = arith.mulf %41, %42 : vector<16x8xf32>
    %44 = vector.extract_strided_slice %6 {offsets = [0, 112], sizes = [16, 8], strides = [1, 1]} : vector<16x288xf32> to vector<16x8xf32>
    %45 = vector.extract_strided_slice %6 {offsets = [0, 208], sizes = [16, 8], strides = [1, 1]} : vector<16x288xf32> to vector<16x8xf32>
    %cst_17 = arith.constant dense<0.000000e+00> : vector<16x16xf32>
    %46 = tpu.matmul %43, %44, %cst_17 {dimension_numbers = #tpu.dot_dimension_numbers<[1], [1], [0], [0], [0, 0, 1, 0], [], []>} : vector<16x8xf32>, vector<16x8xf32>, vector<16x16xf32> -> vector<16x16xf32>
    %cst_18 = arith.constant dense<0xFF800000> : vector<16xf32>
    %47 = vector.multi_reduction <maximumf>, %46, %cst_18 [1] : vector<16x16xf32> to vector<16xf32>
    %48 = vector.shape_cast %47 : vector<16xf32> to vector<16x1xf32>
    %49 = vector.broadcast %48 : vector<16x1xf32> to vector<16x16xf32>
    %50 = arith.subf %46, %49 : vector<16x16xf32>
    %51 = math.exp %50 : vector<16x16xf32>
    %cst_19 = arith.constant dense<0.000000e+00> : vector<16xf32>
    %52 = vector.multi_reduction <add>, %51, %cst_19 [1] : vector<16x16xf32> to vector<16xf32>
    %53 = vector.shape_cast %52 : vector<16xf32> to vector<16x1xf32>
    %54 = tpu.reciprocal %53 {approx = true} : vector<16x1xf32> -> vector<16x1xf32>
    %55 = vector.broadcast %54 : vector<16x1xf32> to vector<16x16xf32>
    %56 = arith.mulf %51, %55 : vector<16x16xf32>
    %cst_20 = arith.constant dense<0.000000e+00> : vector<16x8xf32>
    %57 = tpu.matmul %56, %45, %cst_20 {dimension_numbers = #tpu.dot_dimension_numbers<[1], [0], [0], [1], [0, 0, 1, 1], [], []>} : vector<16x16xf32>, vector<16x8xf32>, vector<16x8xf32> -> vector<16x8xf32>
    %58 = vector.extract_strided_slice %6 {offsets = [0, 24], sizes = [16, 8], strides = [1, 1]} : vector<16x288xf32> to vector<16x8xf32>
    %cst_21 = arith.constant 0.353553385 : f32
    %59 = vector.broadcast %cst_21 : f32 to vector<16x8xf32>
    %60 = arith.mulf %58, %59 : vector<16x8xf32>
    %61 = vector.extract_strided_slice %6 {offsets = [0, 120], sizes = [16, 8], strides = [1, 1]} : vector<16x288xf32> to vector<16x8xf32>
    %62 = vector.extract_strided_slice %6 {offsets = [0, 216], sizes = [16, 8], strides = [1, 1]} : vector<16x288xf32> to vector<16x8xf32>
    %cst_22 = arith.constant dense<0.000000e+00> : vector<16x16xf32>
    %63 = tpu.matmul %60, %61, %cst_22 {dimension_numbers = #tpu.dot_dimension_numbers<[1], [1], [0], [0], [0, 0, 1, 0], [], []>} : vector<16x8xf32>, vector<16x8xf32>, vector<16x16xf32> -> vector<16x16xf32>
    %cst_23 = arith.constant dense<0xFF800000> : vector<16xf32>
    %64 = vector.multi_reduction <maximumf>, %63, %cst_23 [1] : vector<16x16xf32> to vector<16xf32>
    %65 = vector.shape_cast %64 : vector<16xf32> to vector<16x1xf32>
    %66 = vector.broadcast %65 : vector<16x1xf32> to vector<16x16xf32>
    %67 = arith.subf %63, %66 : vector<16x16xf32>
    %68 = math.exp %67 : vector<16x16xf32>
    %cst_24 = arith.constant dense<0.000000e+00> : vector<16xf32>
    %69 = vector.multi_reduction <add>, %68, %cst_24 [1] : vector<16x16xf32> to vector<16xf32>
    %70 = vector.shape_cast %69 : vector<16xf32> to vector<16x1xf32>
    %71 = tpu.reciprocal %70 {approx = true} : vector<16x1xf32> -> vector<16x1xf32>
    %72 = vector.broadcast %71 : vector<16x1xf32> to vector<16x16xf32>
    %73 = arith.mulf %68, %72 : vector<16x16xf32>
    %cst_25 = arith.constant dense<0.000000e+00> : vector<16x8xf32>
    %74 = tpu.matmul %73, %62, %cst_25 {dimension_numbers = #tpu.dot_dimension_numbers<[1], [0], [0], [1], [0, 0, 1, 1], [], []>} : vector<16x16xf32>, vector<16x8xf32>, vector<16x8xf32> -> vector<16x8xf32>
    %75 = vector.extract_strided_slice %6 {offsets = [0, 32], sizes = [16, 8], strides = [1, 1]} : vector<16x288xf32> to vector<16x8xf32>
    %cst_26 = arith.constant 0.353553385 : f32
    %76 = vector.broadcast %cst_26 : f32 to vector<16x8xf32>
    %77 = arith.mulf %75, %76 : vector<16x8xf32>
    %78 = vector.extract_strided_slice %6 {offsets = [0, 128], sizes = [16, 8], strides = [1, 1]} : vector<16x288xf32> to vector<16x8xf32>
    %79 = vector.extract_strided_slice %6 {offsets = [0, 224], sizes = [16, 8], strides = [1, 1]} : vector<16x288xf32> to vector<16x8xf32>
    %cst_27 = arith.constant dense<0.000000e+00> : vector<16x16xf32>
    %80 = tpu.matmul %77, %78, %cst_27 {dimension_numbers = #tpu.dot_dimension_numbers<[1], [1], [0], [0], [0, 0, 1, 0], [], []>} : vector<16x8xf32>, vector<16x8xf32>, vector<16x16xf32> -> vector<16x16xf32>
    %cst_28 = arith.constant dense<0xFF800000> : vector<16xf32>
    %81 = vector.multi_reduction <maximumf>, %80, %cst_28 [1] : vector<16x16xf32> to vector<16xf32>
    %82 = vector.shape_cast %81 : vector<16xf32> to vector<16x1xf32>
    %83 = vector.broadcast %82 : vector<16x1xf32> to vector<16x16xf32>
    %84 = arith.subf %80, %83 : vector<16x16xf32>
    %85 = math.exp %84 : vector<16x16xf32>
    %cst_29 = arith.constant dense<0.000000e+00> : vector<16xf32>
    %86 = vector.multi_reduction <add>, %85, %cst_29 [1] : vector<16x16xf32> to vector<16xf32>
    %87 = vector.shape_cast %86 : vector<16xf32> to vector<16x1xf32>
    %88 = tpu.reciprocal %87 {approx = true} : vector<16x1xf32> -> vector<16x1xf32>
    %89 = vector.broadcast %88 : vector<16x1xf32> to vector<16x16xf32>
    %90 = arith.mulf %85, %89 : vector<16x16xf32>
    %cst_30 = arith.constant dense<0.000000e+00> : vector<16x8xf32>
    %91 = tpu.matmul %90, %79, %cst_30 {dimension_numbers = #tpu.dot_dimension_numbers<[1], [0], [0], [1], [0, 0, 1, 1], [], []>} : vector<16x16xf32>, vector<16x8xf32>, vector<16x8xf32> -> vector<16x8xf32>
    %92 = vector.extract_strided_slice %6 {offsets = [0, 40], sizes = [16, 8], strides = [1, 1]} : vector<16x288xf32> to vector<16x8xf32>
    %cst_31 = arith.constant 0.353553385 : f32
    %93 = vector.broadcast %cst_31 : f32 to vector<16x8xf32>
    %94 = arith.mulf %92, %93 : vector<16x8xf32>
    %95 = vector.extract_strided_slice %6 {offsets = [0, 136], sizes = [16, 8], strides = [1, 1]} : vector<16x288xf32> to vector<16x8xf32>
    %96 = vector.extract_strided_slice %6 {offsets = [0, 232], sizes = [16, 8], strides = [1, 1]} : vector<16x288xf32> to vector<16x8xf32>
    %cst_32 = arith.constant dense<0.000000e+00> : vector<16x16xf32>
    %97 = tpu.matmul %94, %95, %cst_32 {dimension_numbers = #tpu.dot_dimension_numbers<[1], [1], [0], [0], [0, 0, 1, 0], [], []>} : vector<16x8xf32>, vector<16x8xf32>, vector<16x16xf32> -> vector<16x16xf32>
    %cst_33 = arith.constant dense<0xFF800000> : vector<16xf32>
    %98 = vector.multi_reduction <maximumf>, %97, %cst_33 [1] : vector<16x16xf32> to vector<16xf32>
    %99 = vector.shape_cast %98 : vector<16xf32> to vector<16x1xf32>
    %100 = vector.broadcast %99 : vector<16x1xf32> to vector<16x16xf32>
    %101 = arith.subf %97, %100 : vector<16x16xf32>
    %102 = math.exp %101 : vector<16x16xf32>
    %cst_34 = arith.constant dense<0.000000e+00> : vector<16xf32>
    %103 = vector.multi_reduction <add>, %102, %cst_34 [1] : vector<16x16xf32> to vector<16xf32>
    %104 = vector.shape_cast %103 : vector<16xf32> to vector<16x1xf32>
    %105 = tpu.reciprocal %104 {approx = true} : vector<16x1xf32> -> vector<16x1xf32>
    %106 = vector.broadcast %105 : vector<16x1xf32> to vector<16x16xf32>
    %107 = arith.mulf %102, %106 : vector<16x16xf32>
    %cst_35 = arith.constant dense<0.000000e+00> : vector<16x8xf32>
    %108 = tpu.matmul %107, %96, %cst_35 {dimension_numbers = #tpu.dot_dimension_numbers<[1], [0], [0], [1], [0, 0, 1, 1], [], []>} : vector<16x16xf32>, vector<16x8xf32>, vector<16x8xf32> -> vector<16x8xf32>
    %109 = vector.extract_strided_slice %6 {offsets = [0, 48], sizes = [16, 8], strides = [1, 1]} : vector<16x288xf32> to vector<16x8xf32>
    %cst_36 = arith.constant 0.353553385 : f32
    %110 = vector.broadcast %cst_36 : f32 to vector<16x8xf32>
    %111 = arith.mulf %109, %110 : vector<16x8xf32>
    %112 = vector.extract_strided_slice %6 {offsets = [0, 144], sizes = [16, 8], strides = [1, 1]} : vector<16x288xf32> to vector<16x8xf32>
    %113 = vector.extract_strided_slice %6 {offsets = [0, 240], sizes = [16, 8], strides = [1, 1]} : vector<16x288xf32> to vector<16x8xf32>
    %cst_37 = arith.constant dense<0.000000e+00> : vector<16x16xf32>
    %114 = tpu.matmul %111, %112, %cst_37 {dimension_numbers = #tpu.dot_dimension_numbers<[1], [1], [0], [0], [0, 0, 1, 0], [], []>} : vector<16x8xf32>, vector<16x8xf32>, vector<16x16xf32> -> vector<16x16xf32>
    %cst_38 = arith.constant dense<0xFF800000> : vector<16xf32>
    %115 = vector.multi_reduction <maximumf>, %114, %cst_38 [1] : vector<16x16xf32> to vector<16xf32>
    %116 = vector.shape_cast %115 : vector<16xf32> to vector<16x1xf32>
    %117 = vector.broadcast %116 : vector<16x1xf32> to vector<16x16xf32>
    %118 = arith.subf %114, %117 : vector<16x16xf32>
    %119 = math.exp %118 : vector<16x16xf32>
    %cst_39 = arith.constant dense<0.000000e+00> : vector<16xf32>
    %120 = vector.multi_reduction <add>, %119, %cst_39 [1] : vector<16x16xf32> to vector<16xf32>
    %121 = vector.shape_cast %120 : vector<16xf32> to vector<16x1xf32>
    %122 = tpu.reciprocal %121 {approx = true} : vector<16x1xf32> -> vector<16x1xf32>
    %123 = vector.broadcast %122 : vector<16x1xf32> to vector<16x16xf32>
    %124 = arith.mulf %119, %123 : vector<16x16xf32>
    %cst_40 = arith.constant dense<0.000000e+00> : vector<16x8xf32>
    %125 = tpu.matmul %124, %113, %cst_40 {dimension_numbers = #tpu.dot_dimension_numbers<[1], [0], [0], [1], [0, 0, 1, 1], [], []>} : vector<16x16xf32>, vector<16x8xf32>, vector<16x8xf32> -> vector<16x8xf32>
    %126 = vector.extract_strided_slice %6 {offsets = [0, 56], sizes = [16, 8], strides = [1, 1]} : vector<16x288xf32> to vector<16x8xf32>
    %cst_41 = arith.constant 0.353553385 : f32
    %127 = vector.broadcast %cst_41 : f32 to vector<16x8xf32>
    %128 = arith.mulf %126, %127 : vector<16x8xf32>
    %129 = vector.extract_strided_slice %6 {offsets = [0, 152], sizes = [16, 8], strides = [1, 1]} : vector<16x288xf32> to vector<16x8xf32>
    %130 = vector.extract_strided_slice %6 {offsets = [0, 248], sizes = [16, 8], strides = [1, 1]} : vector<16x288xf32> to vector<16x8xf32>
    %cst_42 = arith.constant dense<0.000000e+00> : vector<16x16xf32>
    %131 = tpu.matmul %128, %129, %cst_42 {dimension_numbers = #tpu.dot_dimension_numbers<[1], [1], [0], [0], [0, 0, 1, 0], [], []>} : vector<16x8xf32>, vector<16x8xf32>, vector<16x16xf32> -> vector<16x16xf32>
    %cst_43 = arith.constant dense<0xFF800000> : vector<16xf32>
    %132 = vector.multi_reduction <maximumf>, %131, %cst_43 [1] : vector<16x16xf32> to vector<16xf32>
    %133 = vector.shape_cast %132 : vector<16xf32> to vector<16x1xf32>
    %134 = vector.broadcast %133 : vector<16x1xf32> to vector<16x16xf32>
    %135 = arith.subf %131, %134 : vector<16x16xf32>
    %136 = math.exp %135 : vector<16x16xf32>
    %cst_44 = arith.constant dense<0.000000e+00> : vector<16xf32>
    %137 = vector.multi_reduction <add>, %136, %cst_44 [1] : vector<16x16xf32> to vector<16xf32>
    %138 = vector.shape_cast %137 : vector<16xf32> to vector<16x1xf32>
    %139 = tpu.reciprocal %138 {approx = true} : vector<16x1xf32> -> vector<16x1xf32>
    %140 = vector.broadcast %139 : vector<16x1xf32> to vector<16x16xf32>
    %141 = arith.mulf %136, %140 : vector<16x16xf32>
    %cst_45 = arith.constant dense<0.000000e+00> : vector<16x8xf32>
    %142 = tpu.matmul %141, %130, %cst_45 {dimension_numbers = #tpu.dot_dimension_numbers<[1], [0], [0], [1], [0, 0, 1, 1], [], []>} : vector<16x16xf32>, vector<16x8xf32>, vector<16x8xf32> -> vector<16x8xf32>
    %143 = vector.extract_strided_slice %6 {offsets = [0, 64], sizes = [16, 8], strides = [1, 1]} : vector<16x288xf32> to vector<16x8xf32>
    %cst_46 = arith.constant 0.353553385 : f32
    %144 = vector.broadcast %cst_46 : f32 to vector<16x8xf32>
    %145 = arith.mulf %143, %144 : vector<16x8xf32>
    %146 = vector.extract_strided_slice %6 {offsets = [0, 160], sizes = [16, 8], strides = [1, 1]} : vector<16x288xf32> to vector<16x8xf32>
    %147 = vector.extract_strided_slice %6 {offsets = [0, 256], sizes = [16, 8], strides = [1, 1]} : vector<16x288xf32> to vector<16x8xf32>
    %cst_47 = arith.constant dense<0.000000e+00> : vector<16x16xf32>
    %148 = tpu.matmul %145, %146, %cst_47 {dimension_numbers = #tpu.dot_dimension_numbers<[1], [1], [0], [0], [0, 0, 1, 0], [], []>} : vector<16x8xf32>, vector<16x8xf32>, vector<16x16xf32> -> vector<16x16xf32>
    %cst_48 = arith.constant dense<0xFF800000> : vector<16xf32>
    %149 = vector.multi_reduction <maximumf>, %148, %cst_48 [1] : vector<16x16xf32> to vector<16xf32>
    %150 = vector.shape_cast %149 : vector<16xf32> to vector<16x1xf32>
    %151 = vector.broadcast %150 : vector<16x1xf32> to vector<16x16xf32>
    %152 = arith.subf %148, %151 : vector<16x16xf32>
    %153 = math.exp %152 : vector<16x16xf32>
    %cst_49 = arith.constant dense<0.000000e+00> : vector<16xf32>
    %154 = vector.multi_reduction <add>, %153, %cst_49 [1] : vector<16x16xf32> to vector<16xf32>
    %155 = vector.shape_cast %154 : vector<16xf32> to vector<16x1xf32>
    %156 = tpu.reciprocal %155 {approx = true} : vector<16x1xf32> -> vector<16x1xf32>
    %157 = vector.broadcast %156 : vector<16x1xf32> to vector<16x16xf32>
    %158 = arith.mulf %153, %157 : vector<16x16xf32>
    %cst_50 = arith.constant dense<0.000000e+00> : vector<16x8xf32>
    %159 = tpu.matmul %158, %147, %cst_50 {dimension_numbers = #tpu.dot_dimension_numbers<[1], [0], [0], [1], [0, 0, 1, 1], [], []>} : vector<16x16xf32>, vector<16x8xf32>, vector<16x8xf32> -> vector<16x8xf32>
    %160 = vector.extract_strided_slice %6 {offsets = [0, 72], sizes = [16, 8], strides = [1, 1]} : vector<16x288xf32> to vector<16x8xf32>
    %cst_51 = arith.constant 0.353553385 : f32
    %161 = vector.broadcast %cst_51 : f32 to vector<16x8xf32>
    %162 = arith.mulf %160, %161 : vector<16x8xf32>
    %163 = vector.extract_strided_slice %6 {offsets = [0, 168], sizes = [16, 8], strides = [1, 1]} : vector<16x288xf32> to vector<16x8xf32>
    %164 = vector.extract_strided_slice %6 {offsets = [0, 264], sizes = [16, 8], strides = [1, 1]} : vector<16x288xf32> to vector<16x8xf32>
    %cst_52 = arith.constant dense<0.000000e+00> : vector<16x16xf32>
    %165 = tpu.matmul %162, %163, %cst_52 {dimension_numbers = #tpu.dot_dimension_numbers<[1], [1], [0], [0], [0, 0, 1, 0], [], []>} : vector<16x8xf32>, vector<16x8xf32>, vector<16x16xf32> -> vector<16x16xf32>
    %cst_53 = arith.constant dense<0xFF800000> : vector<16xf32>
    %166 = vector.multi_reduction <maximumf>, %165, %cst_53 [1] : vector<16x16xf32> to vector<16xf32>
    %167 = vector.shape_cast %166 : vector<16xf32> to vector<16x1xf32>
    %168 = vector.broadcast %167 : vector<16x1xf32> to vector<16x16xf32>
    %169 = arith.subf %165, %168 : vector<16x16xf32>
    %170 = math.exp %169 : vector<16x16xf32>
    %cst_54 = arith.constant dense<0.000000e+00> : vector<16xf32>
    %171 = vector.multi_reduction <add>, %170, %cst_54 [1] : vector<16x16xf32> to vector<16xf32>
    %172 = vector.shape_cast %171 : vector<16xf32> to vector<16x1xf32>
    %173 = tpu.reciprocal %172 {approx = true} : vector<16x1xf32> -> vector<16x1xf32>
    %174 = vector.broadcast %173 : vector<16x1xf32> to vector<16x16xf32>
    %175 = arith.mulf %170, %174 : vector<16x16xf32>
    %cst_55 = arith.constant dense<0.000000e+00> : vector<16x8xf32>
    %176 = tpu.matmul %175, %164, %cst_55 {dimension_numbers = #tpu.dot_dimension_numbers<[1], [0], [0], [1], [0, 0, 1, 1], [], []>} : vector<16x16xf32>, vector<16x8xf32>, vector<16x8xf32> -> vector<16x8xf32>
    %177 = vector.extract_strided_slice %6 {offsets = [0, 80], sizes = [16, 8], strides = [1, 1]} : vector<16x288xf32> to vector<16x8xf32>
    %cst_56 = arith.constant 0.353553385 : f32
    %178 = vector.broadcast %cst_56 : f32 to vector<16x8xf32>
    %179 = arith.mulf %177, %178 : vector<16x8xf32>
    %180 = vector.extract_strided_slice %6 {offsets = [0, 176], sizes = [16, 8], strides = [1, 1]} : vector<16x288xf32> to vector<16x8xf32>
    %181 = vector.extract_strided_slice %6 {offsets = [0, 272], sizes = [16, 8], strides = [1, 1]} : vector<16x288xf32> to vector<16x8xf32>
    %cst_57 = arith.constant dense<0.000000e+00> : vector<16x16xf32>
    %182 = tpu.matmul %179, %180, %cst_57 {dimension_numbers = #tpu.dot_dimension_numbers<[1], [1], [0], [0], [0, 0, 1, 0], [], []>} : vector<16x8xf32>, vector<16x8xf32>, vector<16x16xf32> -> vector<16x16xf32>
    %cst_58 = arith.constant dense<0xFF800000> : vector<16xf32>
    %183 = vector.multi_reduction <maximumf>, %182, %cst_58 [1] : vector<16x16xf32> to vector<16xf32>
    %184 = vector.shape_cast %183 : vector<16xf32> to vector<16x1xf32>
    %185 = vector.broadcast %184 : vector<16x1xf32> to vector<16x16xf32>
    %186 = arith.subf %182, %185 : vector<16x16xf32>
    %187 = math.exp %186 : vector<16x16xf32>
    %cst_59 = arith.constant dense<0.000000e+00> : vector<16xf32>
    %188 = vector.multi_reduction <add>, %187, %cst_59 [1] : vector<16x16xf32> to vector<16xf32>
    %189 = vector.shape_cast %188 : vector<16xf32> to vector<16x1xf32>
    %190 = tpu.reciprocal %189 {approx = true} : vector<16x1xf32> -> vector<16x1xf32>
    %191 = vector.broadcast %190 : vector<16x1xf32> to vector<16x16xf32>
    %192 = arith.mulf %187, %191 : vector<16x16xf32>
    %cst_60 = arith.constant dense<0.000000e+00> : vector<16x8xf32>
    %193 = tpu.matmul %192, %181, %cst_60 {dimension_numbers = #tpu.dot_dimension_numbers<[1], [0], [0], [1], [0, 0, 1, 1], [], []>} : vector<16x16xf32>, vector<16x8xf32>, vector<16x8xf32> -> vector<16x8xf32>
    %194 = vector.extract_strided_slice %6 {offsets = [0, 88], sizes = [16, 8], strides = [1, 1]} : vector<16x288xf32> to vector<16x8xf32>
    %cst_61 = arith.constant 0.353553385 : f32
    %195 = vector.broadcast %cst_61 : f32 to vector<16x8xf32>
    %196 = arith.mulf %194, %195 : vector<16x8xf32>
    %197 = vector.extract_strided_slice %6 {offsets = [0, 184], sizes = [16, 8], strides = [1, 1]} : vector<16x288xf32> to vector<16x8xf32>
    %198 = vector.extract_strided_slice %6 {offsets = [0, 280], sizes = [16, 8], strides = [1, 1]} : vector<16x288xf32> to vector<16x8xf32>
    %cst_62 = arith.constant dense<0.000000e+00> : vector<16x16xf32>
    %199 = tpu.matmul %196, %197, %cst_62 {dimension_numbers = #tpu.dot_dimension_numbers<[1], [1], [0], [0], [0, 0, 1, 0], [], []>} : vector<16x8xf32>, vector<16x8xf32>, vector<16x16xf32> -> vector<16x16xf32>
    %cst_63 = arith.constant dense<0xFF800000> : vector<16xf32>
    %200 = vector.multi_reduction <maximumf>, %199, %cst_63 [1] : vector<16x16xf32> to vector<16xf32>
    %201 = vector.shape_cast %200 : vector<16xf32> to vector<16x1xf32>
    %202 = vector.broadcast %201 : vector<16x1xf32> to vector<16x16xf32>
    %203 = arith.subf %199, %202 : vector<16x16xf32>
    %204 = math.exp %203 : vector<16x16xf32>
    %cst_64 = arith.constant dense<0.000000e+00> : vector<16xf32>
    %205 = vector.multi_reduction <add>, %204, %cst_64 [1] : vector<16x16xf32> to vector<16xf32>
    %206 = vector.shape_cast %205 : vector<16xf32> to vector<16x1xf32>
    %207 = tpu.reciprocal %206 {approx = true} : vector<16x1xf32> -> vector<16x1xf32>
    %208 = vector.broadcast %207 : vector<16x1xf32> to vector<16x16xf32>
    %209 = arith.mulf %204, %208 : vector<16x16xf32>
    %cst_65 = arith.constant dense<0.000000e+00> : vector<16x8xf32>
    %210 = tpu.matmul %209, %198, %cst_65 {dimension_numbers = #tpu.dot_dimension_numbers<[1], [0], [0], [1], [0, 0, 1, 1], [], []>} : vector<16x16xf32>, vector<16x8xf32>, vector<16x8xf32> -> vector<16x8xf32>
    %211 = tpu.concatenate %23, %40, %57, %74, %91, %108, %125, %142, %159, %176, %193, %210 in 1 : vector<16x8xf32>, vector<16x8xf32>, vector<16x8xf32>, vector<16x8xf32>, vector<16x8xf32>, vector<16x8xf32>, vector<16x8xf32>, vector<16x8xf32>, vector<16x8xf32>, vector<16x8xf32>, vector<16x8xf32>, vector<16x8xf32> -> vector<16x96xf32>
    %c0_66 = arith.constant 0 : index
    %c0_67 = arith.constant 0 : index
    %212 = vector.load %arg4[%c0_66, %c0_67] : memref<96x96xf32, #tpu.memory_space<vmem>>, vector<96x96xf32>
    %cst_68 = arith.constant dense<0.000000e+00> : vector<16x96xf32>
    %213 = tpu.matmul %211, %212, %cst_68 {dimension_numbers = #tpu.dot_dimension_numbers<[1], [0], [0], [1], [0, 0, 1, 1], [], []>} : vector<16x96xf32>, vector<96x96xf32>, vector<16x96xf32> -> vector<16x96xf32>
    %c0_69 = arith.constant 0 : index
    %c0_70 = arith.constant 0 : index
    %214 = vector.load %arg5[%c0_69, %c0_70] : memref<1x96xf32, #tpu.memory_space<vmem>>, vector<1x96xf32>
    %215 = vector.broadcast %214 : vector<1x96xf32> to vector<16x96xf32>
    %216 = arith.addf %213, %215 : vector<16x96xf32>
    %c0_71 = arith.constant 0 : index
    %c0_72 = arith.constant 0 : index
    %c0_73 = arith.constant 0 : index
    %217 = vector.load %arg6[%c0_71, %c0_72, %c0_73] : memref<1x16x96xf32, #tpu.memory_space<vmem>>, vector<1x16x96xf32>
    %218 = vector.shape_cast %217 : vector<1x16x96xf32> to vector<16x96xf32>
    %219 = vector.shape_cast %216 : vector<16x96xf32> to vector<1x16x96xf32>
    tpu.vector_store %arg6[%c0_71, %c0_72, %c0_73], %219 {strides = array<i32>} : memref<1x16x96xf32, #tpu.memory_space<vmem>>, vector<1x16x96xf32>,
    return
  }
  func.func @transform_0(%arg0: i32) -> (i32, i32, i32) {
    %c0_i32 = arith.constant 0 : i32
    %c0_i32_0 = arith.constant 0 : i32
    %c0_i32_1 = arith.constant 0 : i32
    return %arg0, %c0_i32, %c0_i32_0 : i32, i32, i32
  }
  func.func @transform_1(%arg0: i32) -> (i32, i32) {
    %c0_i32 = arith.constant 0 : i32
    %c0_i32_0 = arith.constant 0 : i32
    %c0_i32_1 = arith.constant 0 : i32
    return %c0_i32, %c0_i32_0 : i32, i32
  }
  func.func @transform_2(%arg0: i32) -> (i32, i32) {
    %c0_i32 = arith.constant 0 : i32
    %c0_i32_0 = arith.constant 0 : i32
    %c0_i32_1 = arith.constant 0 : i32
    return %c0_i32, %c0_i32_0 : i32, i32
  }
  func.func @transform_3(%arg0: i32) -> (i32, i32) {
    %c0_i32 = arith.constant 0 : i32
    %c0_i32_0 = arith.constant 0 : i32
    %c0_i32_1 = arith.constant 0 : i32
    return %c0_i32, %c0_i32_0 : i32, i32
  }
  func.func @transform_4(%arg0: i32) -> (i32, i32) {
    %c0_i32 = arith.constant 0 : i32
    %c0_i32_0 = arith.constant 0 : i32
    %c0_i32_1 = arith.constant 0 : i32
    return %c0_i32, %c0_i32_0 : i32, i32
  }
  func.func @transform_5(%arg0: i32) -> (i32, i32, i32) {
    %c0_i32 = arith.constant 0 : i32
    %c0_i32_0 = arith.constant 0 : i32
    %c0_i32_1 = arith.constant 0 : i32
    return %arg0, %c0_i32, %c0_i32_0 : i32, i32, i32
  }
}

</mosaic_0001>

<bundles_post_ra>
// kernel: tpu_custom_call.1
= control target key start
LH: loop header
LB: loop body
LE: loop exit
PB: predicated region body
PF: predicated region fallthrough
CT: control target
= control target key end

     0   :  { %10 = vsyncpa [#allocation3], 0  ;;  %s4976_s0 = inlined_call_operand.hbm [shape: f32[2,16,96], index: 0, kind: input, shape index: {}]   ;;  %s4977_s1 = inlined_call_operand.hbm [shape: f32[96,288], index: 1, kind: input, shape index: {}]   ;;  %s4978_s2 = inlined_call_operand.vmem [shape: f32[1,288], index: 2, kind: input, shape index: {}]   ;;  %s4979_s3 = inlined_call_operand.hbm [shape: f32[96,96], index: 3, kind: input, shape index: {}]   ;;  %s4980_s4 = inlined_call_operand.vmem [shape: f32[1,96], index: 4, kind: input, shape index: {}]   ;;  %s4981_s5 = inlined_call_operand.hbm [shape: f32[2,16,96], index: 5, kind: output, shape index: {}]  }
   0x1   :  { %12 = vsyncpa [#allocation3 + $0x1], 0 }
   0x2   :  { %13 = vsyncpa [#allocation6], 0 }
   0x3   :  { %14 = vsyncpa [#allocation4], 0 }
   0x4   :  { %16 = vsyncpa [#allocation4 + $0x1], 0  ;;  %s4355_s18 = smov 0   ;;  %s4357_s19 = smov 0  }
   0x5   :  { %s4359_s20 = smov 0   ;;  %s4361_s21 = smov 0  }
   0x6 LB: > { %s4376_s22 = sadd.s32 4294967295, %s4298_s21   ;;  %s3211_s23 = sadd.s32 4294967294, %s4298_s21   ;;  %s4298_s21 = sphi %s4361_s21, %s5005_s21   ;;  %s4294_s20 = sphi %s4359_s20, %s5004_s20   ;;  %s4290_s19 = sphi %s4357_s19, %s5003_s19   ;;  %s4286_s18 = sphi %s4355_s18, %s5002_s18  }
   0x7   : > { %p42_p0 = scmp.ne.s32.totalorder %s4290_s19, %s4286_s18  ;;  %p4982_p1 = scmp.eq.s32.totalorder %s4376_s22, 0 }
   0x8   : > { %p156_p3 = scmp.eq.s32.totalorder %s3211_s23, 1  ;;  %p3212_p5 = scmp.ge.s32.totalorder %s4298_s21, 1 }
   0x9   : > { %p4385_p4 = por %p4982_p1, %p42_p0  ;;  %p163_p7 = scmp.lt.s32.totalorder %s4298_s21, 3 }
   0xa   : > { %p4390_p6 = por %p156_p3, %p42_p0  ;;  %s4300_s27 = smov [#allocation5]  }
   0xb   : > { %s4986_s24 = scalar_select %p4385_p4, 1, 0 }
   0xc   : > { %s4987_s25 = scalar_select %p4390_p6, 1, 0 }
   0xd   : > { %p4395_p8 = pnand %p3212_p5, %p163_p7  ;;  %s175_s28 = sshll.u32 %s4300_s27, 4  ;;  %s4399_s28 = int_to_ptr.vmem [resolvable:$true] %s175_s28 }
   0xe   : > { %s4301_s30 = smov [#allocation7]   ;;  %s4142_s9 = scalar_lea.hbm %s4977_s1, 4608 }
   0xf   : > { %p3860_p9 = pneg %p4395_p8  ;;  %s191_s6 = sshll.u32 %s4301_s30, 4  ;;  %s4410_s6 = int_to_ptr.vmem [resolvable:$true] %s191_s6 }
  0x10   : > { %p4143_p12 = scmp.ne.s32.totalorder %s4977_s1, %s4142_s9  ;;  %p4149_p5 = scmp.lt.u32.totalorder %s4142_s9, %s4977_s1 }
  0x11   : > { %p4406_p11 = pnand %p3860_p9, %p4982_p1 }
  0x13   : > { %p4144_p13 = pneg %p4406_p11 }
  0x15   : > { %p4145_p0 = pnand %p4144_p13, %p4143_p12 }
  0x17   : > { %p4146_p3 = pneg %p4145_p0 }
  0x19   : > { %p4151_p7 = pnand %p4149_p5, %p4146_p3 }
  0x1b   : > { %4154 = shalt.err (!%p4151_p7)
}
  0x1c   : > { %s4155_s14 = scalar_lea.vmem %s4399_s28, 4608  ;;  %p4163_p2 = scmp.lt.s32.totalorder %s4399_s28, %s4399_s28 }
  0x1d   : > { %p4156_p9 = scmp.ne.s32.totalorder %s4399_s28, %s4155_s14  ;;  %p4164_p12 = scmp.lt.s32.totalorder %s4155_s14, %s4155_s14 }
  0x1f   : > { %p4158_p10 = pnand %p4156_p9, %p4144_p13  ;;  %p4165_p0 = por %p4164_p12, %p4163_p2 }
  0x21   : > { %p4159_p1 = pneg %p4158_p10 }
  0x23   : > { %p4166_p6 = pnand %p4165_p0, %p4159_p1 }
  0x25   : > { %4169 = shalt.err (!%p4166_p6)
}
  0x26   : > { %s4302_s15 = smov 384   ;;  %s4303_s16 = smov 24  }
  0x27   : > { %3863 = dma.hbm_to_vmem [thread:$0]  (!%p4406_p11), %s4977_s1, 4608, %s4399_s28, [#allocation6], %s4302_s15, %s4302_s15, %s4303_s16  }
  0x28   : > { %s4170_s7 = scalar_lea.hbm %s4979_s3, 1536 }
  0x29   : > { %p4171_p2 = scmp.ne.s32.totalorder %s4979_s3, %s4170_s7  ;;  %p4177_p10 = scmp.lt.u32.totalorder %s4170_s7, %s4979_s3 }
  0x2b   : > { %p4173_p1 = pnand %p4171_p2, %p4144_p13 }
  0x2d   : > { %p4174_p6 = pneg %p4173_p1 }
  0x2f   : > { %p4179_p3 = pnand %p4177_p10, %p4174_p6 }
  0x31   : > { %4182 = shalt.err (!%p4179_p3)
}
  0x32   : > { %s4183_s28 = scalar_lea.vmem %s4410_s6, 1536  ;;  %p4191_p12 = scmp.lt.s32.totalorder %s4410_s6, %s4410_s6 }
  0x33   : > { %p4184_p5 = scmp.ne.s32.totalorder %s4410_s6, %s4183_s28  ;;  %p4192_p0 = scmp.lt.s32.totalorder %s4183_s28, %s4183_s28 }
  0x35   : > { %p4186_p7 = pnand %p4184_p5, %p4144_p13  ;;  %p4193_p2 = por %p4192_p0, %p4191_p12 }
  0x37   : > { %p4187_p9 = pneg %p4186_p7 }
  0x39   : > { %p4194_p1 = pnand %p4193_p2, %p4187_p9 }
  0x3b   : > { %4197 = shalt.err (!%p4194_p1)
}
  0x3c   : > { %s4304_s12 = smov 128   ;;  %s4305_s13 = smov 8  }
  0x3d   : > { %3866 = dma.hbm_to_vmem [thread:$0]  (!%p4406_p11), %s4979_s3, 1536, %s4410_s6, [#allocation6], %s4304_s12, %s4304_s12, %s4305_s13  }
  0x3e   : > { %s4468_s16 = sadd.s32 1, %s4298_s21   ;;  %s29_s23 = sadd.s32 1, %s4294_s20 }
  0x3f   : > { %s26_s17 = ssub.s32 %s4298_s21, %s4468_s16  ;;  %p36_p6 = scmp.ne.s32.totalorder %s4294_s20, %s4290_s19 }
  0x40   : > { %p27_p13 = scmp.eq.s32.totalorder %s26_s17, 0  ;;  %p37_p10 = scmp.eq.s32.totalorder %s4298_s21, 0 }
  0x41   : > { %p4990_p5 = scmp.eq.s32.totalorder %s4376_s22, 1  ;;  %p3877_p9 = scmp.lt.s32.totalorder %s4298_s21, 2 }
  0x42   : > { %s4477_s27 = scalar_select %p27_p13, %s4294_s20, %s29_s23  }
  0x43   : > { %p38_p3 = por %p37_p10, %p36_p6  ;;  %p4481_p7 = por %p4990_p5, %p36_p6 }
  0x44   : > { %s208_s30 = sand.u32 1, %s4294_s20   ;;  %s3308_s6 = sshll.u32 %s4298_s21, 8 }
  0x45   : > { %s4991_s29 = scalar_select %p4481_p7, 1, 0 }
  0x46   : > { %s3216_s7 = sshll.u32 %s208_s30, 4  ;;  %s4491_s10 = scalar_lea.hbm %s4976_s0, %s3308_s6 }
  0x47   : > { %s212_s11 = scalar_lea.vmem [#allocation2], %s3216_s7  ;;  %p4495_p11 = pnand %p3877_p9, %p38_p3 }
  0x48   : > { %s219_s28 = sshll.u32 %s212_s11, 4  ;;  %s4499_s15 = scalar_lea.sflag [#allocation3], %s208_s30  ;;  %s4493_s28 = int_to_ptr.vmem [resolvable:$true] %s219_s28 }
  0x49   : > { %s4198_s17 = scalar_lea.hbm %s4491_s10, 256  ;;  %p4200_p0 = pneg %p4495_p11 }
  0x4a   : > { %p4199_p12 = scmp.ne.s32.totalorder %s4491_s10, %s4198_s17  ;;  %s4203_s6 = scalar_lea.hbm %s4976_s0, 512 }
  0x4b   : > { %p4204_p13 = scmp.lt.u32.totalorder %s4491_s10, %s4976_s0  ;;  %p4205_p6 = scmp.lt.u32.totalorder %s4203_s6, %s4198_s17 }
  0x4c   : > { %p4201_p2 = pnand %p4200_p0, %p4199_p12  ;;  %p4207_p3 = scmp.lt.u32.totalorder %s4198_s17, %s4491_s10 }
  0x4d   : > { %p4206_p10 = por %p4205_p6, %p4204_p13 }
  0x4e   : > { %p4202_p1 = pneg %p4201_p2 }
  0x4f   : > { %p4208_p5 = por %p4207_p3, %p4206_p10 }
  0x51   : > { %p4209_p9 = pnand %p4208_p5, %p4202_p1 }
  0x53   : > { %4212 = shalt.err (!%p4209_p9)
}
  0x54   : > { %s4213_s30 = scalar_lea.vmem %s4493_s28, 256  ;;  %s4306_s11 = smov [#allocation2]  }
  0x55   : > { %p4214_p12 = scmp.ne.s32.totalorder %s4493_s28, %s4213_s30  ;;  %s4218_s23 = sshll.u32 %s4306_s11, 4  ;;  %s4219_s23 = int_to_ptr.vmem [resolvable:$false] %s4218_s23 }
  0x56   : > { %s4220_s7 = scalar_lea.vmem %s4219_s23, 512  ;;  %p4221_p4 = scmp.lt.s32.totalorder %s4493_s28, %s4219_s23 }
  0x57   : > { %p4216_p2 = pnand %p4214_p12, %p4200_p0  ;;  %p4222_p13 = scmp.lt.s32.totalorder %s4220_s7, %s4213_s30 }
  0x59   : > { %p4217_p7 = pneg %p4216_p2  ;;  %p4223_p6 = por %p4222_p13, %p4221_p4 }
  0x5b   : > { %p4224_p10 = pnand %p4223_p6, %p4217_p7 }
  0x5d   : > { %4227 = shalt.err (!%p4224_p10)
}
  0x5e   : > { %3870 = dma.hbm_to_vmem [thread:$0]  (!%p4495_p11), %s4491_s10, 256, %s4493_s28, %s4499_s15, %s4304_s12, %s4304_s12, %s4305_s13  }
  0x5f   : > { %231 = sbr.rel (%p4395_p8) target bundleno = 7497 (0x1d49), region = 40  ;;  %s4533_s17 = sand.u32 (!%p4395_p8), 1, %s4290_s19  }
  0x60   : > { %s4985_s6 = sshll.u32 (!%p4395_p8), %s4533_s17, 4  ;;  %s234_s8 = scalar_lea.sflag (!%p4395_p8), [#allocation3], %s4533_s17 }
  0x61   : > { %s4539_s14 = scalar_lea.vmem (!%p4395_p8), [#allocation2], %s4985_s6  ;;  %p4993_p4 = scmp.ne.s32.totalorder (!%p4395_p8), %s4986_s24, 0 }
  0x66   : > { %4273 = dma.done.wait (%p4993_p4), %s234_s8, 256  }
  0x67   : > { %4275 = vsyncadd (%p4993_p4), %s234_s8, 4294967040  ;;  %p4994_p7 = scmp.eq.s32.totalorder %s4376_s22, 0 }
  0x69   : > { %4277 = dma.done.wait (%p4994_p7), [#allocation6], 6144   ;;  %p4995_p8 = pmov %p4994_p7 }
  0x6a   : > { %v4307_v0 = vmov 0.0   ;;  %v275_v1 = vld [vmem:[#allocation5 + $0x8] sm:$0xff]  ;;  %v278_v2 = vld [vmem:[#allocation5 + $0x20] sm:$0xff]  ;;  %v277_v5 = vld [vmem:[#allocation5 + $0x18] sm:$0xff]  ;;  %vm327_vm0 = vcmask 785408   ;;  %v312_v39 = vlaneseq  ;;  %vm494_vm1 = vcmask 64512  }
  0x6b   : > { %4279 = vsyncadd (%p4995_p8), [#allocation6], 4294961152  ;;  %398 = vmatprep.mubr.f32.mxu0 %v4307_v0  ;;  %v274_v3 = vld [vmem:[#allocation5] sm:$0xff]  ;;  %v3656_v4 = vpack.c.bf16 %v278_v2, %v275_v1  ;;  %v281_v6 = vld [vmem:[#allocation5 + $0x38] sm:$0xff]  ;;  %s4308_s12 = smov 32   ;;  %vm580_vm3 = vcmask 130048  }
  0x6c   : > { %v284_v7 = vld [vmem:[#allocation5 + $0x50] sm:$0xff]  ;;  %v3658_v8 = vpack.c.bf16 %v277_v5, %v274_v3  ;;  %v283_v11 = vld [vmem:[#allocation5 + $0x48] sm:$0xff]  ;;  %v290_v13 = vld [vmem:[#allocation5 + $0x80] sm:$0xff]  ;;  %v4557_v40 = vshrl.u32 %v312_v39, 7  ;;  %s4309_s13 = smov 64   ;;  %s4310_s10 = smov 24  }
  0x6d   : > { %v3660_v9 = vpack.c.bf16 %v284_v7, %v281_v6  ;;  %v280_v10 = vld [vmem:[#allocation5 + $0x30] sm:$0xff]  ;;  %v287_v12 = vld [vmem:[#allocation5 + $0x68] sm:$0xff]  ;;  %3657 = vmatprep.subr.bf16.mxu0 %v3656_v4  ;;  %v286_v16 = vld [vmem:[#allocation5 + $0x60] sm:$0xff]  ;;  %s4311_s28 = smov 120   ;;  %s4312_s15 = smov 56   ;;  %vm2976_vm4 = vcmask 195584  }
  0x6e   : > { %3659 = vmatpush1.bf16.msra.mxu0 %v3658_v8  ;;  %v3662_v14 = vpack.c.bf16 %v283_v11, %v280_v10  ;;  %v3664_v15 = vpack.c.bf16 %v290_v13, %v287_v12  ;;  %v289_v17 = vld [vmem:[#allocation5 + $0x78] sm:$0xff]  ;;  %v296_v19 = vld [vmem:[#allocation5 + $0xb0] sm:$0xff]  ;;  %v295_v24 = vld [vmem:[#allocation5 + $0xa8] sm:$0xff]  ;;  %v314_v41 = vsub.s32 0, %v4557_v40  ;;  %v318_v44 = vsub.s32 1, %v4557_v40  ;;  %s4313_s9 = smov 16  }
  0x6f   : > { %3661 = vmatprep.subr.bf16.mxu0 %v3660_v9  ;;  %v293_v18 = vld [vmem:[#allocation5 + $0x98] sm:$0xff]  ;;  %v3666_v20 = vpack.c.bf16 %v289_v17, %v286_v16  ;;  %v272_v21 = vld [vmem:[%s4539_s14] sm:$0xff]  ;;  %v299_v25 = vld [vmem:[#allocation5 + $0xc8] sm:$0xff]  ;;  %s4314_s30 = smov 112   ;;  %s4315_s11 = smov 8   ;;  %vm2979_vm5 = vcmask 261120  }
  0x70   : > { %v3668_v22 = vpack.c.bf16 %v296_v19, %v293_v18  ;;  %v292_v23 = vld [vmem:[#allocation5 + $0x90] sm:$0xff]  ;;  %3458 = vmatprep.mubr.msk.f32.mxu1 %vm327_vm0, %v272_v21  ;;  %v302_v26 = vld [vmem:[#allocation5 + $0xe0] sm:$0xff]  ;;  %v301_v30 = vld [vmem:[#allocation5 + $0xd8] sm:$0xff]  ;;  %s4316_s23 = smov 104   ;;  %s4317_s7 = smov 48   ;;  %vm2982_vm6 = vcmask 326656  }
  0x71   : > { %v3670_v27 = vpack.c.bf16 %v295_v24, %v292_v23  ;;  %v3672_v28 = vpack.c.bf16 %v302_v26, %v299_v25  ;;  %v298_v29 = vld [vmem:[#allocation5 + $0xc0] sm:$0xff]  ;;  %v305_v31 = vld [vmem:[#allocation5 + $0xf8] sm:$0xff]  ;;  %v308_v32 = vld [vmem:[#allocation5 + $0x110] sm:$0xff]  ;;  %s4318_s8 = smov 96   ;;  %s4320_s24 = smov 88   ;;  %vm2985_vm7 = vcmask 392192  }
  0x72   : > { %3663 = vmatpush1.bf16.msra.mxu0 %v3662_v14  ;;  %v3674_v33 = vpack.c.bf16 %v301_v30, %v298_v29  ;;  %v3676_v34 = vpack.c.bf16 %v308_v32, %v305_v31  ;;  %v304_v35 = vld [vmem:[#allocation5 + $0xf0] sm:$0xff]  ;;  %v307_v36 = vld [vmem:[#allocation5 + $0x108] sm:$0xff]  ;;  %v4563_v42 = vld [vmem:[%s4978_s2] sm:$0x7]  ;;  %s4321_s26 = smov 80   ;;  %s4322_s6 = smov 72  }
  0x73   : > { %3665 = vmatprep.subr.bf16.mxu0 %v3664_v15  ;;  %v3678_v37 = vpack.c.bf16 %v307_v36, %v304_v35  ;;  %v4553_v38 = vld [vmem:[%s4539_s14 + $0x8] sm:$0xff]  ;;  %v315_v43 = vrot.slane %v4563_v42, %v314_v41  ;;  %v319_v48 = vrot.slane %v4563_v42, %v318_v44  ;;  %vm4582_vm2 = vmpackc.low %vm494_vm1, %vm494_vm1  ;;  %v282_v2 = vld [vmem:[#allocation5 + $0x40] sm:$0xff]  ;;  %s4319_s14 = smov 40   ;;  %vm2988_vm8 = vcmask 457728   ;;  %p4999_p0 = scmp.ne.s32.totalorder %s4991_s29, 0 }
  0x74   : > { %v279_v1 = vld [vmem:[#allocation5 + $0x28] sm:$0xff]  ;;  %v285_v4 = vld [vmem:[#allocation5 + $0x58] sm:$0xff]  ;;  %v288_v6 = vld [vmem:[#allocation5 + $0x70] sm:$0xff]  ;;  %vm2991_vm9 = vcmask 523264   ;;  %vm2994_vm10 = vcmask 588800   ;;  %vm2997_vm11 = vcmask 654336  }
  0x75   : > { %v3684_v5 = vpack.c.bf16 %v285_v4, %v282_v2  ;;  %v291_v7 = vld [vmem:[#allocation5 + $0x88] sm:$0xff]  ;;  %v294_v9 = vld [vmem:[#allocation5 + $0xa0] sm:$0xff]  ;;  %v297_v10 = vld [vmem:[#allocation5 + $0xb8] sm:$0xff]  ;;  %vm3000_vm12 = vcmask 719872  }
  0x76   : > { %3667 = vmatpush1.bf16.msra.mxu0 %v3666_v20  ;;  %v3688_v8 = vpack.c.bf16 %v291_v7, %v288_v6  ;;  %v3692_v11 = vpack.c.bf16 %v297_v10, %v294_v9  ;;  %v300_v16 = vld [vmem:[#allocation5 + $0xd0] sm:$0xff]  ;;  %v303_v17 = vld [vmem:[#allocation5 + $0xe8] sm:$0xff]  ;;  %v306_v19 = vld [vmem:[#allocation5 + $0x100] sm:$0xff] }
  0x77   : > { %3669 = vmatprep.subr.bf16.mxu0 %v3668_v22  ;;  %v3696_v18 = vpack.c.bf16 %v303_v17, %v300_v16  ;;  %v309_v20 = vld [vmem:[#allocation5 + $0x118] sm:$0xff] }
  0x7a   : > { %3671 = vmatpush1.bf16.msra.mxu0 %v3670_v27 }
  0x7b   : > { %3673 = vmatprep.subr.bf16.mxu0 %v3672_v28 }
  0x7e   : > { %3675 = vmatpush1.bf16.msra.mxu0 %v3674_v33 }
  0x7f   : > { %3677 = vmatprep.subr.bf16.mxu0 %v3676_v34 }
  0x82   : > { %3679 = vmatpush1.bf16.msra.mxu0 %v3678_v37 }
  0x85   : > { %3224 = vmatmul.mubr.msk.f32.vlgmr.msra.gmra.mrb[0].mxu0 %vm327_vm0, %v272_v21  ;;  %v3700_v21 = vpack.c.bf16 %v309_v20, %v306_v19 }
  0x86   : > { %404 = vmatprep.mubr.f32.mxu0 %v4307_v0  ;;  %v276_v0 = vld [vmem:[#allocation5 + $0x10] sm:$0xff] }
  0x87   : > { %v3680_v3 = vpack.c.bf16 %v279_v1, %v276_v0 }
  0x89   : > { %3225 = vmatmul.mubr.msk.f32.gmra.mrb[2].mxu0 %vm327_vm0, %v4553_v38  ;;  %3681 = vmatprep.subr.bf16.mxu1 %v3680_v3 }
  0x8a   : > { %3683 = vmatpush3.bf16.msra.mxu1 %v3680_v3 }
  0x8b   : > { %3685 = vmatprep.subr.bf16.mxu1 %v3684_v5 }
  0x8e   : > { %3687 = vmatpush3.bf16.msra.mxu1 %v3684_v5 }
  0x8f   : > { %3689 = vmatprep.subr.bf16.mxu1 %v3688_v8 }
  0x92   : > { %3691 = vmatpush3.bf16.msra.mxu1 %v3688_v8 }
  0x93   : > { %3693 = vmatprep.subr.bf16.mxu1 %v3692_v11 }
  0x96   : > { %3695 = vmatpush3.bf16.msra.mxu1 %v3692_v11 }
  0x97   : > { %3697 = vmatprep.subr.bf16.mxu1 %v3696_v18 }
  0x9a   : > { %3699 = vmatpush3.bf16.msra.mxu1 %v3696_v18 }
  0x9b   : > { %3701 = vmatprep.subr.bf16.mxu1 %v3700_v21 }
  0x9e   : > { %3703 = vmatpush3.bf16.msra.mxu1 %v3700_v21 }
  0xa1   : > { %3459 = vmatmul.mubr.msk.f32.vlgmr.msra.gmra.mrb[0].mxu1 %vm327_vm0, %v4553_v38 }
 0x158   : > { %v400_v45 = vpop.f32.mrb[0].mxu0 }
 0x159   : > { %v401_v46 = vadd.f32 %v400_v45, %v315_v43  ;;  %v402_v47 = vpop.f32.mrb[1].mxu0 }
 0x15a   : > { %v403_v53 = vadd.f32 %v402_v47, %v319_v48 }
 0x15b   : > { %v4568_v49 = vmul.f32 0.35355338, %v401_v46 }
 0x15c   : > { %v406_v50 = vpop.f32.mrb[2].mxu0 }
 0x15d   : > { %v407_v51 = vadd.f32 %v406_v50, %v315_v43  ;;  %v408_v52 = vpop.f32.mrb[3].mxu0  ;;  %3465 = vmatprep.mubr.msk.f32.mxu0 %vm494_vm1, %v4568_v49 }
 0x15e   : > { %v409_v54 = vadd.f32 %v408_v52, %v319_v48 }
 0x15f   : > { %v4572_v55 = vpack.i.bf16 %v407_v51, %v401_v46  ;;  %v4590_v63 = vmul.f32 0.35355338, %v407_v51 }
 0x160   : > { %v4574_v56 = vpack.i.bf16 %v409_v54, %v403_v53  ;;  %v4578_v57 = vpack.c.bf16 %v409_v54, %v403_v53  ;;  %v322_v53 = vsub.s32 2, %v4557_v40 }
 0x161   : > { %3937 = vrot.lane.b32.xlu0 %v4572_v55, %s4308_s12 }
 0x162   : > { %v323_v54 = vrot.slane %v4563_v42, %v322_v53 }
 0x174   : > { %v3460_v41 = vpop.f32.mrb[0].mxu1 }
 0x175   : > { %v477_v43 = vpop.f32.mrb[1].mxu1 }
 0x1d3   : > { %v3938_v58 = vpop.permute.xlu0 %3937 }
 0x1d4   : > { %v3940_v59 = vunpack.i.h.bf16 %v3938_v58  ;;  %v3939_v60 = vunpack.i.l.bf16 %v3938_v58  ;;  %v483_v58 = vadd.f32 %v3460_v41, %v323_v54 }
 0x1d6   : > { %v3704_v62 = vpack.c.bf16 %v3940_v59, %v3939_v60  ;;  %v478_v59 = vadd.f32 %v477_v43, %v323_v54 }
 0x1d8   : > { %3706 = vmatprep.subr.msk.bf16.mxu0 %vm4582_vm2, %v3704_v62  ;;  %v4618_v60 = vpack.c.bf16 %v483_v58, %v478_v59 }
 0x1d9   : > { %3709 = vmatpush3.bf16.xpose.msk.msra.mxu0 %vm4582_vm2, %v3704_v62  ;;  %v4620_v62 = vpack.i.bf16 %v483_v58, %v478_v59 }
 0x1e0   : > { %3466 = vmatmul.mubr.msk.f32.vlgmr.msra.gmra.mrb[4].mxu0 %vm494_vm1, %v4590_v63 }
 0x2b3   : > { %v3467_v12 = vpop.f32.mrb[4].mxu0 }
 0x2b4   : > { %v571_v13 = vpop.f32.mrb[5].mxu0  ;;  %v584_v14 = vsel %vm580_vm3, %v3467_v12, -inf }
 0x2b5   : > { %585 = vmax.xlane.f32.xlu1 %v584_v14  ;;  %v581_v15 = vsel %vm580_vm3, %v571_v13, -inf }
 0x2b6   : > { %582 = vmax.xlane.f32.xlu0 %v581_v15 }
 0x2c6   : > { %3942 = vrot.lane.b32.xlu1 %v4574_v56, %s4309_s13 }
 0x2ca   : > { %3947 = vrot.lane.b32.xlu1 %v4572_v55, %s4310_s10 }
 0x2cc   : > { %694 = vrot.lane.b32.xlu0 %v4590_v63, %s4311_s28 }
 0x342   : > { %v586_v22 = vpop.xlane.xlu1 %585 }
 0x343   : > { %v588_v23 = vsub.f32 %v3467_v12, %v586_v22  ;;  %v583_v24 = vpop.xlane.xlu0 %582 }
 0x344   : > { %v587_v25 = vsub.f32 %v571_v13, %v583_v24 }
 0x345   : > { %v591_v26 = vmul.f32 1.442695, %v588_v23 }
 0x346   : > { %v589_v27 = vmul.f32 1.442695, %v587_v25  ;;  %v3943_v28 = vpop.permute.xlu1 %3942 }
 0x347   : > { %4046 = vpow2.f32 %v591_v26  ;;  %v3945_v29 = vunpack.i.h.bf16 %v3943_v28  ;;  %v3944_v30 = vunpack.i.l.bf16 %v3943_v28  ;;  %v695_v52 = vpop.permute.xlu0 %694 }
 0x348   : > { %4048 = vpow2.f32 %v589_v27 }
 0x349   : > { %v3710_v31 = vpack.c.bf16 %v3945_v29, %v3944_v30 }
 0x34a   : > { %v3948_v32 = vpop.permute.xlu1 %3947 }
 0x34b   : > { %v3950_v33 = vunpack.i.h.bf16 %v3948_v32  ;;  %v3949_v34 = vunpack.i.l.bf16 %v3948_v32  ;;  %3711 = vmatprep.subr.bf16.mxu1 %v3710_v31 }
 0x34c   : > { %3713 = vmatpush3.bf16.msra.mxu1 %v3710_v31 }
 0x34d   : > { %v3714_v35 = vpack.c.bf16 %v3950_v33, %v3949_v34 }
 0x34f   : > { %3716 = vmatprep.subr.msk.bf16.mxu1 %vm4582_vm2, %v3714_v35 }
 0x351   : > { %v4047_v36 = vpop.eup %4046 }
 0x352   : > { %v596_v37 = vsel %vm580_vm3, %v4047_v36, 0.0  ;;  %v4049_v38 = vpop.eup %4048 }
 0x353   : > { %597 = vadd.xlane.f32.xlu1 %v596_v37  ;;  %v593_v39 = vsel %vm580_vm3, %v4049_v38, 0.0 }
 0x357   : > { %594 = vadd.xlane.f32.xlu1 %v593_v39 }
 0x368   : > { %692 = vrot.lane.b32.xlu1 %v4568_v49, %s4311_s28 }
 0x3e0   : > { %v598_v44 = vpop.xlane.xlu1 %597 }
 0x3e1   : > { %4050 = vrcp.f32 %v598_v44 }
 0x3e4   : > { %v595_v45 = vpop.xlane.xlu1 %594 }
 0x3e5   : > { %4052 = vrcp.f32 %v595_v45 }
 0x3e8   : > { %v693_v51 = vpop.permute.xlu1 %692 }
 0x3eb   : > { %v4051_v46 = vpop.eup %4050 }
 0x3ec   : > { %v602_v50 = vmul.f32 %v4051_v46, %v4047_v36 }
 0x3ef   : > { %v4053_v47 = vpop.eup %4052 }
 0x3f0   : > { %v601_v48 = vmul.f32 %v4053_v47, %v4049_v38 }
 0x3f2   : > { %3472 = vmatprep.mubr.msk.f32.mxu1 %vm580_vm3, %v601_v48 }
 0x3f3   : > { %3473 = vmatmul.mubr.msk.f32.vlgmr.msra.gmra.mrb[2].mxu1 %vm580_vm3, %v602_v50 }
 0x3f4   : > { %3719 = vmatpush3.bf16.xpose.msk.msra.mxu1 %vm4582_vm2, %v3714_v35  ;;  %3479 = vmatprep.mubr.msk.f32.mxu1 %vm494_vm1, %v693_v51 }
 0x3fb   : > { %3480 = vmatmul.mubr.msk.f32.vlgmr.msra.gmra.mrb[4].mxu1 %vm494_vm1, %v695_v52 }
 0x4c6   : > { %v4622_v0 = vpop.f32.mrb[2].mxu1 }
 0x4c7   : > { %v4624_v1 = vpop.f32.mrb[3].mxu1 }
 0x4ce   : > { %v3481_v2 = vpop.f32.mrb[4].mxu1 }
 0x4cf   : > { %v774_v3 = vpop.f32.mrb[5].mxu1  ;;  %v786_v4 = vsel %vm580_vm3, %v3481_v2, -inf }
 0x4d0   : > { %787 = vmax.xlane.f32.xlu0 %v786_v4  ;;  %v783_v5 = vsel %vm580_vm3, %v774_v3, -inf }
 0x4d1   : > { %784 = vmax.xlane.f32.xlu1 %v783_v5 }
 0x4e2   : > { %3952 = vrot.lane.b32.xlu1 %v4574_v56, %s4312_s15 }
 0x4e6   : > { %3957 = vrot.lane.b32.xlu0 %v4572_v55, %s4313_s9  ;;  %892 = vrot.lane.b32.xlu1 %v4568_v49, %s4314_s30 }
 0x55d   : > { %v788_v40 = vpop.xlane.xlu0 %787 }
 0x55e   : > { %v790_v42 = vsub.f32 %v3481_v2, %v788_v40  ;;  %v785_v6 = vpop.xlane.xlu1 %784 }
 0x55f   : > { %v789_v7 = vsub.f32 %v774_v3, %v785_v6 }
 0x560   : > { %v793_v8 = vmul.f32 1.442695, %v790_v42 }
 0x561   : > { %v791_v9 = vmul.f32 1.442695, %v789_v7  ;;  %v3958_v10 = vpop.permute.xlu0 %3957 }
 0x562   : > { %4054 = vpow2.f32 %v793_v8  ;;  %v3953_v11 = vpop.permute.xlu1 %3952  ;;  %v3960_v12 = vunpack.i.h.bf16 %v3958_v10  ;;  %v3959_v13 = vunpack.i.l.bf16 %v3958_v10 }
 0x563   : > { %v3955_v14 = vunpack.i.h.bf16 %v3953_v11  ;;  %v3954_v15 = vunpack.i.l.bf16 %v3953_v11  ;;  %4056 = vpow2.f32 %v791_v9 }
 0x564   : > { %v3724_v17 = vpack.c.bf16 %v3960_v12, %v3959_v13 }
 0x565   : > { %v3720_v16 = vpack.c.bf16 %v3955_v14, %v3954_v15 }
 0x566   : > { %v893_v22 = vpop.permute.xlu1 %892 }
 0x567   : > { %3721 = vmatprep.subr.bf16.mxu1 %v3720_v16 }
 0x568   : > { %3723 = vmatpush3.bf16.msra.mxu1 %v3720_v16 }
 0x569   : > { %3726 = vmatprep.subr.msk.bf16.mxu1 %vm4582_vm2, %v3724_v17 }
 0x56c   : > { %v4055_v18 = vpop.eup %4054 }
 0x56d   : > { %v798_v19 = vsel %vm580_vm3, %v4055_v18, 0.0  ;;  %v4057_v20 = vpop.eup %4056 }
 0x56e   : > { %799 = vadd.xlane.f32.xlu1 %v798_v19  ;;  %v795_v21 = vsel %vm580_vm3, %v4057_v20, 0.0 }
 0x572   : > { %796 = vadd.xlane.f32.xlu1 %v795_v21 }
 0x583   : > { %894 = vrot.lane.b32.xlu1 %v4590_v63, %s4314_s30 }
 0x5fb   : > { %v800_v23 = vpop.xlane.xlu1 %799 }
 0x5fc   : > { %4058 = vrcp.f32 %v800_v23 }
 0x5ff   : > { %v797_v24 = vpop.xlane.xlu1 %796 }
 0x600   : > { %4060 = vrcp.f32 %v797_v24 }
 0x603   : > { %v895_v29 = vpop.permute.xlu1 %894 }
 0x606   : > { %v4059_v25 = vpop.eup %4058 }
 0x607   : > { %v804_v28 = vmul.f32 %v4059_v25, %v4055_v18 }
 0x60a   : > { %v4061_v26 = vpop.eup %4060 }
 0x60b   : > { %v803_v27 = vmul.f32 %v4061_v26, %v4057_v20 }
 0x60d   : > { %3486 = vmatprep.mubr.msk.f32.mxu1 %vm580_vm3, %v803_v27 }
 0x60e   : > { %3487 = vmatmul.mubr.msk.f32.vlgmr.msra.gmra.mrb[6].mxu1 %vm580_vm3, %v804_v28 }
 0x60f   : > { %3729 = vmatpush3.bf16.xpose.msk.msra.mxu1 %vm4582_vm2, %v3724_v17  ;;  %3493 = vmatprep.mubr.msk.f32.mxu1 %vm494_vm1, %v893_v22 }
 0x616   : > { %3494 = vmatmul.mubr.msk.f32.vlgmr.msra.gmra.mrb[8].mxu1 %vm494_vm1, %v895_v29 }
 0x6e1   : > { %v4646_v30 = vpop.f32.mrb[6].mxu1 }
 0x6e2   : > { %v4648_v31 = vpop.f32.mrb[7].mxu1 }
 0x6e9   : > { %v3495_v32 = vpop.f32.mrb[8].mxu1 }
 0x6ea   : > { %v974_v33 = vpop.f32.mrb[9].mxu1  ;;  %v986_v34 = vsel %vm580_vm3, %v3495_v32, -inf }
 0x6eb   : > { %987 = vmax.xlane.f32.xlu0 %v986_v34  ;;  %v983_v35 = vsel %vm580_vm3, %v974_v33, -inf }
 0x6ec   : > { %984 = vmax.xlane.f32.xlu1 %v983_v35 }
 0x778   : > { %v988_v36 = vpop.xlane.xlu0 %987 }
 0x779   : > { %v990_v37 = vsub.f32 %v3495_v32, %v988_v36  ;;  %v985_v38 = vpop.xlane.xlu1 %984 }
 0x77a   : > { %v989_v39 = vsub.f32 %v974_v33, %v985_v38 }
 0x77b   : > { %v993_v41 = vmul.f32 1.442695, %v990_v37 }
 0x77c   : > { %v991_v43 = vmul.f32 1.442695, %v989_v39 }
 0x77d   : > { %4062 = vpow2.f32 %v993_v41 }
 0x77e   : > { %4064 = vpow2.f32 %v991_v43 }
 0x787   : > { %v4063_v44 = vpop.eup %4062 }
 0x788   : > { %v4065_v45 = vpop.eup %4064  ;;  %v998_v46 = vsel %vm580_vm3, %v4063_v44, 0.0 }
 0x789   : > { %999 = vadd.xlane.f32.xlu1 %v998_v46  ;;  %v995_v47 = vsel %vm580_vm3, %v4065_v45, 0.0 }
 0x78a   : > { %996 = vadd.xlane.f32.xlu0 %v995_v47 }
 0x79a   : > { %3967 = vrot.lane.b32.xlu1 %v4572_v55, %s4315_s11 }
 0x79e   : > { %1092 = vrot.lane.b32.xlu1 %v4568_v49, %s4316_s23 }
 0x7a0   : > { %3962 = vrot.lane.b32.xlu0 %v4574_v56, %s4317_s7 }
 0x7a4   : > { %1094 = vrot.lane.b32.xlu0 %v4590_v63, %s4316_s23 }
 0x816   : > { %v1000_v48 = vpop.xlane.xlu1 %999 }
 0x817   : > { %4066 = vrcp.f32 %v1000_v48  ;;  %v997_v50 = vpop.xlane.xlu0 %996 }
 0x818   : > { %4068 = vrcp.f32 %v997_v50 }
 0x81a   : > { %v3968_v51 = vpop.permute.xlu1 %3967 }
 0x81b   : > { %v3963_v52 = vpop.permute.xlu0 %3962  ;;  %v3970_v53 = vunpack.i.h.bf16 %v3968_v51  ;;  %v3969_v54 = vunpack.i.l.bf16 %v3968_v51 }
 0x81c   : > { %v3965_v55 = vunpack.i.h.bf16 %v3963_v52  ;;  %v3964_v58 = vunpack.i.l.bf16 %v3963_v52 }
 0x81d   : > { %v3734_v2 = vpack.c.bf16 %v3970_v53, %v3969_v54 }
 0x81e   : > { %v3730_v59 = vpack.c.bf16 %v3965_v55, %v3964_v58  ;;  %v1093_v42 = vpop.permute.xlu1 %1092 }
 0x81f   : > { %v1095_v6 = vpop.permute.xlu0 %1094 }
 0x820   : > { %3731 = vmatprep.subr.bf16.mxu1 %v3730_v59 }
 0x821   : > { %v4067_v3 = vpop.eup %4066  ;;  %3733 = vmatpush3.bf16.msra.mxu1 %v3730_v59 }
 0x822   : > { %v4069_v4 = vpop.eup %4068  ;;  %3736 = vmatprep.subr.msk.bf16.mxu1 %vm4582_vm2, %v3734_v2  ;;  %v1004_v40 = vmul.f32 %v4067_v3, %v4063_v44 }
 0x823   : > { %v1003_v5 = vmul.f32 %v4069_v4, %v4065_v45 }
 0x825   : > { %3500 = vmatprep.mubr.msk.f32.mxu1 %vm580_vm3, %v1003_v5 }
 0x826   : > { %3501 = vmatmul.mubr.msk.f32.vlgmr.msra.gmra.mrb[10].mxu1 %vm580_vm3, %v1004_v40 }
 0x827   : > { %3507 = vmatprep.mubr.msk.f32.mxu1 %vm494_vm1, %v1093_v42 }
 0x82a   : > { %3739 = vmatpush3.bf16.xpose.msk.msra.mxu1 %vm4582_vm2, %v3734_v2 }
 0x831   : > { %3508 = vmatmul.mubr.msk.f32.vlgmr.msra.gmra.mrb[12].mxu1 %vm494_vm1, %v1095_v6 }
 0x8f9   : > { %v4670_v7 = vpop.f32.mrb[10].mxu1 }
 0x8fa   : > { %v4672_v8 = vpop.f32.mrb[11].mxu1 }
 0x904   : > { %v3509_v9 = vpop.f32.mrb[12].mxu1 }
 0x905   : > { %v1174_v10 = vpop.f32.mrb[13].mxu1  ;;  %v1186_v11 = vsel %vm580_vm3, %v3509_v9, -inf }
 0x906   : > { %1187 = vmax.xlane.f32.xlu0 %v1186_v11  ;;  %v1183_v12 = vsel %vm580_vm3, %v1174_v10, -inf }
 0x907   : > { %1184 = vmax.xlane.f32.xlu1 %v1183_v12 }
 0x993   : > { %v1188_v13 = vpop.xlane.xlu0 %1187 }
 0x994   : > { %v1190_v14 = vsub.f32 %v3509_v9, %v1188_v13  ;;  %v1185_v15 = vpop.xlane.xlu1 %1184 }
 0x995   : > { %v1189_v16 = vsub.f32 %v1174_v10, %v1185_v15 }
 0x996   : > { %v1193_v17 = vmul.f32 1.442695, %v1190_v14 }
 0x997   : > { %v1191_v18 = vmul.f32 1.442695, %v1189_v16 }
 0x998   : > { %4070 = vpow2.f32 %v1193_v17 }
 0x999   : > { %4072 = vpow2.f32 %v1191_v18 }
 0x9a2   : > { %v4071_v19 = vpop.eup %4070 }
 0x9a3   : > { %v4073_v20 = vpop.eup %4072  ;;  %v1198_v21 = vsel %vm580_vm3, %v4071_v19, 0.0 }
 0x9a4   : > { %1199 = vadd.xlane.f32.xlu1 %v1198_v21  ;;  %v1195_v22 = vsel %vm580_vm3, %v4073_v20, 0.0 }
 0x9a5   : > { %1196 = vadd.xlane.f32.xlu0 %v1195_v22 }
 0x9b5   : > { %1292 = vrot.lane.b32.xlu1 %v4568_v49, %s4318_s8 }
 0x9b9   : > { %1294 = vrot.lane.b32.xlu1 %v4590_v63, %s4318_s8 }
 0x9bb   : > { %3972 = vrot.lane.b32.xlu0 %v4574_v56, %s4319_s14 }
 0xa31   : > { %v1200_v23 = vpop.xlane.xlu1 %1199 }
 0xa32   : > { %4074 = vrcp.f32 %v1200_v23  ;;  %v1197_v24 = vpop.xlane.xlu0 %1196 }
 0xa33   : > { %4076 = vrcp.f32 %v1197_v24 }
 0xa35   : > { %v1293_v35 = vpop.permute.xlu1 %1292 }
 0xa36   : > { %v3973_v25 = vpop.permute.xlu0 %3972 }
 0xa37   : > { %v3975_v26 = vunpack.i.h.bf16 %v3973_v25  ;;  %v3974_v27 = vunpack.i.l.bf16 %v3973_v25 }
 0xa39   : > { %v3740_v28 = vpack.c.bf16 %v3975_v26, %v3974_v27  ;;  %v1295_v36 = vpop.permute.xlu1 %1294 }
 0xa3b   : > { %3741 = vmatprep.subr.bf16.mxu0 %v3740_v28 }
 0xa3c   : > { %v4075_v29 = vpop.eup %4074  ;;  %3743 = vmatpush3.bf16.msra.mxu0 %v3740_v28 }
 0xa3d   : > { %v4077_v32 = vpop.eup %4076  ;;  %3746 = vmatprep.subr.msk.bf16.mxu0 %vm4582_vm2, %v4578_v57  ;;  %v1204_v34 = vmul.f32 %v4075_v29, %v4071_v19 }
 0xa3e   : > { %v1203_v33 = vmul.f32 %v4077_v32, %v4073_v20 }
 0xa40   : > { %3514 = vmatprep.mubr.msk.f32.mxu0 %vm580_vm3, %v1203_v33 }
 0xa41   : > { %3515 = vmatmul.mubr.msk.f32.vlgmr.msra.gmra.mrb[6].mxu0 %vm580_vm3, %v1204_v34 }
 0xa42   : > { %3521 = vmatprep.mubr.msk.f32.mxu0 %vm494_vm1, %v1293_v35 }
 0xa45   : > { %3749 = vmatpush3.bf16.xpose.msk.msra.mxu0 %vm4582_vm2, %v4578_v57 }
 0xa4c   : > { %3522 = vmatmul.mubr.msk.f32.vlgmr.msra.gmra.mrb[8].mxu0 %vm494_vm1, %v1295_v36 }
 0xb14   : > { %v4694_v37 = vpop.f32.mrb[6].mxu0 }
 0xb15   : > { %v4696_v38 = vpop.f32.mrb[7].mxu0 }
 0xb1f   : > { %v3523_v39 = vpop.f32.mrb[8].mxu0 }
 0xb20   : > { %v1370_v41 = vpop.f32.mrb[9].mxu0  ;;  %v1382_v43 = vsel %vm580_vm3, %v3523_v39, -inf }
 0xb21   : > { %1383 = vmax.xlane.f32.xlu1 %v1382_v43  ;;  %v1379_v44 = vsel %vm580_vm3, %v1370_v41, -inf }
 0xb22   : > { %1380 = vmax.xlane.f32.xlu0 %v1379_v44 }
 0xb32   : > { %3977 = vrot.lane.b32.xlu1 %v4574_v56, %s4308_s12 }
 0xb36   : > { %1488 = vrot.lane.b32.xlu1 %v4568_v49, %s4320_s24 }
 0xb3a   : > { %1490 = vrot.lane.b32.xlu1 %v4590_v63, %s4320_s24 }
 0xbae   : > { %v1384_v57 = vpop.xlane.xlu1 %1383 }
 0xbaf   : > { %v1386_v45 = vsub.f32 %v3523_v39, %v1384_v57  ;;  %v1381_v46 = vpop.xlane.xlu0 %1380 }
 0xbb0   : > { %v1385_v47 = vsub.f32 %v1370_v41, %v1381_v46 }
 0xbb1   : > { %v1389_v48 = vmul.f32 1.442695, %v1386_v45 }
 0xbb2   : > { %v1387_v50 = vmul.f32 1.442695, %v1385_v47  ;;  %v3978_v51 = vpop.permute.xlu1 %3977 }
 0xbb3   : > { %4078 = vpow2.f32 %v1389_v48  ;;  %v3980_v52 = vunpack.i.h.bf16 %v3978_v51  ;;  %v3979_v53 = vunpack.i.l.bf16 %v3978_v51 }
 0xbb4   : > { %4080 = vpow2.f32 %v1387_v50 }
 0xbb5   : > { %v3750_v54 = vpack.c.bf16 %v3980_v52, %v3979_v53 }
 0xbb6   : > { %v1489_v13 = vpop.permute.xlu1 %1488 }
 0xbb7   : > { %3751 = vmatprep.subr.bf16.mxu1 %v3750_v54 }
 0xbb8   : > { %3753 = vmatpush3.bf16.msra.mxu1 %v3750_v54 }
 0xbba   : > { %v1491_v14 = vpop.permute.xlu1 %1490 }
 0xbbd   : > { %v4079_v55 = vpop.eup %4078 }
 0xbbe   : > { %v1394_v58 = vsel %vm580_vm3, %v4079_v55, 0.0  ;;  %v4081_v59 = vpop.eup %4080 }
 0xbbf   : > { %1395 = vadd.xlane.f32.xlu0 %v1394_v58  ;;  %v1391_v2 = vsel %vm580_vm3, %v4081_v59, 0.0 }
 0xbc3   : > { %1392 = vadd.xlane.f32.xlu0 %v1391_v2 }
 0xbd9   : > { %3982 = vrot.lane.b32.xlu0 %v4574_v56, %s4311_s28 }
 0xc4c   : > { %v1396_v3 = vpop.xlane.xlu0 %1395 }
 0xc4d   : > { %4082 = vrcp.f32 %v1396_v3 }
 0xc50   : > { %v1393_v4 = vpop.xlane.xlu0 %1392 }
 0xc51   : > { %4084 = vrcp.f32 %v1393_v4 }
 0xc54   : > { %v3983_v5 = vpop.permute.xlu0 %3982 }
 0xc55   : > { %v3985_v40 = vunpack.i.h.bf16 %v3983_v5  ;;  %v3984_v42 = vunpack.i.l.bf16 %v3983_v5 }
 0xc57   : > { %v3754_v6 = vpack.c.bf16 %v3985_v40, %v3984_v42  ;;  %v4083_v9 = vpop.eup %4082 }
 0xc58   : > { %v1400_v12 = vmul.f32 %v4083_v9, %v4079_v55 }
 0xc59   : > { %3756 = vmatprep.subr.msk.bf16.mxu1 %vm4582_vm2, %v3754_v6 }
 0xc5b   : > { %v4085_v10 = vpop.eup %4084 }
 0xc5c   : > { %v1399_v11 = vmul.f32 %v4085_v10, %v4081_v59 }
 0xc5e   : > { %3528 = vmatprep.mubr.msk.f32.mxu1 %vm580_vm3, %v1399_v11 }
 0xc5f   : > { %3529 = vmatmul.mubr.msk.f32.vlgmr.msra.gmra.mrb[14].mxu1 %vm580_vm3, %v1400_v12 }
 0xc60   : > { %3759 = vmatpush3.bf16.xpose.msk.msra.mxu1 %vm4582_vm2, %v3754_v6  ;;  %3535 = vmatprep.mubr.msk.f32.mxu1 %vm494_vm1, %v1489_v13 }
 0xc67   : > { %3536 = vmatmul.mubr.msk.f32.vlgmr.msra.gmra.mrb[16].mxu1 %vm494_vm1, %v1491_v14 }
 0xd32   : > { %v4718_v15 = vpop.f32.mrb[14].mxu1 }
 0xd33   : > { %v4720_v16 = vpop.f32.mrb[15].mxu1 }
 0xd3a   : > { %v3537_v17 = vpop.f32.mrb[16].mxu1 }
 0xd3b   : > { %v1570_v18 = vpop.f32.mrb[17].mxu1  ;;  %v1582_v19 = vsel %vm580_vm3, %v3537_v17, -inf }
 0xd3c   : > { %1583 = vmax.xlane.f32.xlu1 %v1582_v19  ;;  %v1579_v20 = vsel %vm580_vm3, %v1570_v18, -inf }
 0xd3d   : > { %1580 = vmax.xlane.f32.xlu0 %v1579_v20 }
 0xd4d   : > { %3987 = vrot.lane.b32.xlu1 %v4574_v56, %s4310_s10 }
 0xd51   : > { %1688 = vrot.lane.b32.xlu1 %v4568_v49, %s4321_s26 }
 0xd55   : > { %1690 = vrot.lane.b32.xlu1 %v4590_v63, %s4321_s26 }
 0xdc9   : > { %v1584_v21 = vpop.xlane.xlu1 %1583 }
 0xdca   : > { %v1586_v22 = vsub.f32 %v3537_v17, %v1584_v21  ;;  %v1581_v23 = vpop.xlane.xlu0 %1580 }
 0xdcb   : > { %v1585_v24 = vsub.f32 %v1570_v18, %v1581_v23 }
 0xdcc   : > { %v1589_v25 = vmul.f32 1.442695, %v1586_v22 }
 0xdcd   : > { %v1587_v26 = vmul.f32 1.442695, %v1585_v24  ;;  %v3988_v27 = vpop.permute.xlu1 %3987 }
 0xdce   : > { %4086 = vpow2.f32 %v1589_v25  ;;  %v3990_v28 = vunpack.i.h.bf16 %v3988_v27  ;;  %v3989_v29 = vunpack.i.l.bf16 %v3988_v27 }
 0xdcf   : > { %4088 = vpow2.f32 %v1587_v26 }
 0xdd0   : > { %v3760_v32 = vpack.c.bf16 %v3990_v28, %v3989_v29 }
 0xdd1   : > { %v1689_v51 = vpop.permute.xlu1 %1688 }
 0xdd2   : > { %3761 = vmatprep.subr.bf16.mxu0 %v3760_v32 }
 0xdd3   : > { %3763 = vmatpush3.bf16.msra.mxu0 %v3760_v32 }
 0xdd5   : > { %v1691_v52 = vpop.permute.xlu1 %1690 }
 0xdd8   : > { %v4087_v33 = vpop.eup %4086 }
 0xdd9   : > { %v1594_v34 = vsel %vm580_vm3, %v4087_v33, 0.0  ;;  %v4089_v35 = vpop.eup %4088 }
 0xdda   : > { %1595 = vadd.xlane.f32.xlu0 %v1594_v34  ;;  %v1591_v36 = vsel %vm580_vm3, %v4089_v35, 0.0 }
 0xdde   : > { %1592 = vadd.xlane.f32.xlu0 %v1591_v36 }
 0xdf4   : > { %3992 = vrot.lane.b32.xlu0 %v4574_v56, %s4314_s30 }
 0xe67   : > { %v1596_v39 = vpop.xlane.xlu0 %1595 }
 0xe68   : > { %4090 = vrcp.f32 %v1596_v39 }
 0xe6b   : > { %v1593_v41 = vpop.xlane.xlu0 %1592 }
 0xe6c   : > { %4092 = vrcp.f32 %v1593_v41 }
 0xe6f   : > { %v3993_v43 = vpop.permute.xlu0 %3992 }
 0xe70   : > { %v3995_v44 = vunpack.i.h.bf16 %v3993_v43  ;;  %v3994_v57 = vunpack.i.l.bf16 %v3993_v43 }
 0xe72   : > { %v3764_v45 = vpack.c.bf16 %v3995_v44, %v3994_v57  ;;  %v4091_v46 = vpop.eup %4090 }
 0xe73   : > { %v1600_v50 = vmul.f32 %v4091_v46, %v4087_v33 }
 0xe74   : > { %3766 = vmatprep.subr.msk.bf16.mxu0 %vm4582_vm2, %v3764_v45 }
 0xe76   : > { %v4093_v47 = vpop.eup %4092 }
 0xe77   : > { %v1599_v48 = vmul.f32 %v4093_v47, %v4089_v35 }
 0xe79   : > { %3542 = vmatprep.mubr.msk.f32.mxu0 %vm580_vm3, %v1599_v48 }
 0xe7a   : > { %3543 = vmatmul.mubr.msk.f32.vlgmr.msra.gmra.mrb[10].mxu0 %vm580_vm3, %v1600_v50 }
 0xe7b   : > { %3769 = vmatpush3.bf16.xpose.msk.msra.mxu0 %vm4582_vm2, %v3764_v45  ;;  %3549 = vmatprep.mubr.msk.f32.mxu0 %vm494_vm1, %v1689_v51 }
 0xe82   : > { %3550 = vmatmul.mubr.msk.f32.vlgmr.msra.gmra.mrb[12].mxu0 %vm494_vm1, %v1691_v52 }
 0xf4d   : > { %v4742_v53 = vpop.f32.mrb[10].mxu0 }
 0xf4e   : > { %v4744_v54 = vpop.f32.mrb[11].mxu0 }
 0xf55   : > { %v3551_v55 = vpop.f32.mrb[12].mxu0 }
 0xf56   : > { %v1770_v58 = vpop.f32.mrb[13].mxu0  ;;  %v1782_v59 = vsel %vm580_vm3, %v3551_v55, -inf }
 0xf57   : > { %1783 = vmax.xlane.f32.xlu1 %v1782_v59  ;;  %v1779_v2 = vsel %vm580_vm3, %v1770_v58, -inf }
 0xf58   : > { %1780 = vmax.xlane.f32.xlu0 %v1779_v2 }
 0xf68   : > { %3997 = vrot.lane.b32.xlu1 %v4574_v56, %s4313_s9 }
 0xf6c   : > { %1888 = vrot.lane.b32.xlu1 %v4568_v49, %s4322_s6 }
 0xf70   : > { %1890 = vrot.lane.b32.xlu1 %v4590_v63, %s4322_s6 }
 0xfe4   : > { %v1784_v3 = vpop.xlane.xlu1 %1783 }
 0xfe5   : > { %v1786_v4 = vsub.f32 %v3551_v55, %v1784_v3  ;;  %v1781_v5 = vpop.xlane.xlu0 %1780 }
 0xfe6   : > { %v1785_v40 = vsub.f32 %v1770_v58, %v1781_v5 }
 0xfe7   : > { %v1789_v42 = vmul.f32 1.442695, %v1786_v4 }
 0xfe8   : > { %v1787_v6 = vmul.f32 1.442695, %v1785_v40  ;;  %v3998_v9 = vpop.permute.xlu1 %3997 }
 0xfe9   : > { %4094 = vpow2.f32 %v1789_v42  ;;  %v4000_v10 = vunpack.i.h.bf16 %v3998_v9  ;;  %v3999_v11 = vunpack.i.l.bf16 %v3998_v9 }
 0xfea   : > { %4096 = vpow2.f32 %v1787_v6 }
 0xfeb   : > { %v3770_v12 = vpack.c.bf16 %v4000_v10, %v3999_v11 }
 0xfec   : > { %v1889_v29 = vpop.permute.xlu1 %1888 }
 0xfed   : > { %3771 = vmatprep.subr.bf16.mxu1 %v3770_v12 }
 0xfee   : > { %3773 = vmatpush3.bf16.msra.mxu1 %v3770_v12 }
 0xff0   : > { %v1891_v32 = vpop.permute.xlu1 %1890 }
 0xff3   : > { %v4095_v13 = vpop.eup %4094 }
 0xff4   : > { %v1794_v14 = vsel %vm580_vm3, %v4095_v13, 0.0  ;;  %v4097_v17 = vpop.eup %4096 }
 0xff5   : > { %1795 = vadd.xlane.f32.xlu0 %v1794_v14  ;;  %v1791_v18 = vsel %vm580_vm3, %v4097_v17, 0.0 }
 0xff9   : > { %1792 = vadd.xlane.f32.xlu0 %v1791_v18 }
0x100f   : > { %4002 = vrot.lane.b32.xlu0 %v4574_v56, %s4316_s23 }
0x1082   : > { %v1796_v19 = vpop.xlane.xlu0 %1795 }
0x1083   : > { %4098 = vrcp.f32 %v1796_v19 }
0x1086   : > { %v1793_v20 = vpop.xlane.xlu0 %1792 }
0x1087   : > { %4100 = vrcp.f32 %v1793_v20 }
0x108a   : > { %v4003_v21 = vpop.permute.xlu0 %4002 }
0x108b   : > { %v4005_v22 = vunpack.i.h.bf16 %v4003_v21  ;;  %v4004_v23 = vunpack.i.l.bf16 %v4003_v21 }
0x108d   : > { %v3774_v24 = vpack.c.bf16 %v4005_v22, %v4004_v23  ;;  %v4099_v25 = vpop.eup %4098 }
0x108e   : > { %v1800_v28 = vmul.f32 %v4099_v25, %v4095_v13 }
0x108f   : > { %3776 = vmatprep.subr.msk.bf16.mxu1 %vm4582_vm2, %v3774_v24 }
0x1091   : > { %v4101_v26 = vpop.eup %4100 }
0x1092   : > { %v1799_v27 = vmul.f32 %v4101_v26, %v4097_v17 }
0x1094   : > { %3556 = vmatprep.mubr.msk.f32.mxu1 %vm580_vm3, %v1799_v27 }
0x1095   : > { %3557 = vmatmul.mubr.msk.f32.vlgmr.msra.gmra.mrb[18].mxu1 %vm580_vm3, %v1800_v28 }
0x1096   : > { %3779 = vmatpush3.bf16.xpose.msk.msra.mxu1 %vm4582_vm2, %v3774_v24  ;;  %3563 = vmatprep.mubr.msk.f32.mxu1 %vm494_vm1, %v1889_v29 }
0x1097   : > { %3791 = vmatprep.subr.bf16.mxu1 %v4618_v60 }
0x109d   : > { %3564 = vmatmul.mubr.msk.f32.vlgmr.msra.gmra.mrb[20].mxu1 %vm494_vm1, %v1891_v32 }
0x109e   : > { %3793 = vmatpush3.bf16.msra.mxu1 %v4618_v60 }
0x1168   : > { %v4768_v33 = vpop.f32.mrb[18].mxu1 }
0x1169   : > { %v4770_v34 = vpop.f32.mrb[19].mxu1 }
0x1170   : > { %v3565_v35 = vpop.f32.mrb[20].mxu1 }
0x1171   : > { %v1970_v36 = vpop.f32.mrb[21].mxu1  ;;  %v1982_v39 = vsel %vm580_vm3, %v3565_v35, -inf }
0x1172   : > { %1983 = vmax.xlane.f32.xlu1 %v1982_v39  ;;  %v1979_v41 = vsel %vm580_vm3, %v1970_v36, -inf }
0x1173   : > { %1980 = vmax.xlane.f32.xlu0 %v1979_v41 }
0x1183   : > { %4007 = vrot.lane.b32.xlu1 %v4574_v56, %s4315_s11 }
0x1187   : > { %2088 = vrot.lane.b32.xlu1 %v4568_v49, %s4309_s13 }
0x118b   : > { %2090 = vrot.lane.b32.xlu1 %v4590_v63, %s4309_s13 }
0x11ff   : > { %v1984_v60 = vpop.xlane.xlu1 %1983 }
0x1200   : > { %v1986_v43 = vsub.f32 %v3565_v35, %v1984_v60  ;;  %v1981_v44 = vpop.xlane.xlu0 %1980 }
0x1201   : > { %v1985_v57 = vsub.f32 %v1970_v36, %v1981_v44 }
0x1202   : > { %v1989_v45 = vmul.f32 1.442695, %v1986_v43 }
0x1203   : > { %v1987_v46 = vmul.f32 1.442695, %v1985_v57  ;;  %v4008_v47 = vpop.permute.xlu1 %4007 }
0x1204   : > { %4102 = vpow2.f32 %v1989_v45  ;;  %v4010_v48 = vunpack.i.h.bf16 %v4008_v47  ;;  %v4009_v50 = vunpack.i.l.bf16 %v4008_v47 }
0x1205   : > { %4104 = vpow2.f32 %v1987_v46 }
0x1206   : > { %v3780_v51 = vpack.c.bf16 %v4010_v48, %v4009_v50 }
0x1207   : > { %v2089_v12 = vpop.permute.xlu1 %2088 }
0x1208   : > { %3781 = vmatprep.subr.bf16.mxu0 %v3780_v51 }
0x1209   : > { %3783 = vmatpush3.bf16.msra.mxu0 %v3780_v51 }
0x120b   : > { %v2091_v13 = vpop.permute.xlu1 %2090 }
0x120e   : > { %v4103_v52 = vpop.eup %4102 }
0x120f   : > { %v1994_v55 = vsel %vm580_vm3, %v4103_v52, 0.0  ;;  %v4105_v58 = vpop.eup %4104 }
0x1210   : > { %1995 = vadd.xlane.f32.xlu0 %v1994_v55  ;;  %v1991_v59 = vsel %vm580_vm3, %v4105_v58, 0.0 }
0x1214   : > { %1992 = vadd.xlane.f32.xlu0 %v1991_v59 }
0x122a   : > { %4012 = vrot.lane.b32.xlu0 %v4574_v56, %s4318_s8  ;;  %s4323_s8 = smov [#allocation8]  }
0x129d   : > { %v1996_v2 = vpop.xlane.xlu0 %1995 }
0x129e   : > { %4106 = vrcp.f32 %v1996_v2 }
0x12a1   : > { %v1993_v3 = vpop.xlane.xlu0 %1992 }
0x12a2   : > { %4108 = vrcp.f32 %v1993_v3 }
0x12a5   : > { %v4013_v4 = vpop.permute.xlu0 %4012 }
0x12a6   : > { %v4015_v5 = vunpack.i.h.bf16 %v4013_v4  ;;  %v4014_v40 = vunpack.i.l.bf16 %v4013_v4 }
0x12a8   : > { %v3784_v42 = vpack.c.bf16 %v4015_v5, %v4014_v40  ;;  %v4107_v6 = vpop.eup %4106 }
0x12a9   : > { %v2000_v11 = vmul.f32 %v4107_v6, %v4103_v52 }
0x12aa   : > { %3786 = vmatprep.subr.msk.bf16.mxu0 %vm4582_vm2, %v3784_v42 }
0x12ac   : > { %v4109_v9 = vpop.eup %4108 }
0x12ad   : > { %v1999_v10 = vmul.f32 %v4109_v9, %v4105_v58 }
0x12af   : > { %3570 = vmatprep.mubr.msk.f32.mxu0 %vm580_vm3, %v1999_v10 }
0x12b0   : > { %3571 = vmatmul.mubr.msk.f32.vlgmr.msra.gmra.mrb[14].mxu0 %vm580_vm3, %v2000_v11 }
0x12b1   : > { %3789 = vmatpush3.bf16.xpose.msk.msra.mxu0 %vm4582_vm2, %v3784_v42  ;;  %3577 = vmatprep.mubr.msk.f32.mxu0 %vm494_vm1, %v2089_v12 }
0x12b8   : > { %3578 = vmatmul.mubr.msk.f32.vlgmr.msra.gmra.mrb[16].mxu0 %vm494_vm1, %v2091_v13 }
0x1383   : > { %v4792_v14 = vpop.f32.mrb[14].mxu0 }
0x1384   : > { %v4794_v17 = vpop.f32.mrb[15].mxu0 }
0x138b   : > { %v3579_v18 = vpop.f32.mrb[16].mxu0 }
0x138c   : > { %v2170_v19 = vpop.f32.mrb[17].mxu0  ;;  %v2182_v20 = vsel %vm580_vm3, %v3579_v18, -inf }
0x138d   : > { %2183 = vmax.xlane.f32.xlu1 %v2182_v20  ;;  %v2179_v21 = vsel %vm580_vm3, %v2170_v19, -inf }
0x138e   : > { %2180 = vmax.xlane.f32.xlu0 %v2179_v21 }
0x139e   : > { %4017 = vrot.lane.b32.xlu1 %v4574_v56, %s4320_s24 }
0x13a2   : > { %2284 = vrot.lane.b32.xlu1 %v4590_v63, %s4312_s15 }
0x141a   : > { %v2184_v22 = vpop.xlane.xlu1 %2183 }
0x141b   : > { %v2186_v23 = vsub.f32 %v3579_v18, %v2184_v22  ;;  %v2181_v24 = vpop.xlane.xlu0 %2180 }
0x141c   : > { %v2185_v25 = vsub.f32 %v2170_v19, %v2181_v24 }
0x141d   : > { %v2189_v26 = vmul.f32 1.442695, %v2186_v23 }
0x141e   : > { %v2187_v27 = vmul.f32 1.442695, %v2185_v25  ;;  %v4018_v28 = vpop.permute.xlu1 %4017 }
0x141f   : > { %v4020_v29 = vunpack.i.h.bf16 %v4018_v28  ;;  %v4019_v32 = vunpack.i.l.bf16 %v4018_v28 }
0x1420   : > { %4110 = vpow2.f32 %v2187_v27 }
0x1421   : > { %v3794_v35 = vpack.c.bf16 %v4020_v29, %v4019_v32  ;;  %4112 = vpow2.f32 %v2189_v26 }
0x1422   : > { %v2285_v50 = vpop.permute.xlu1 %2284 }
0x1423   : > { %3796 = vmatprep.subr.msk.bf16.mxu1 %vm4582_vm2, %v3794_v35 }
0x142a   : > { %v4111_v36 = vpop.eup %4110 }
0x142b   : > { %v2191_v39 = vsel %vm580_vm3, %v4111_v36, 0.0  ;;  %v4113_v41 = vpop.eup %4112 }
0x142c   : > { %2192 = vadd.xlane.f32.xlu0 %v2191_v39  ;;  %v2194_v60 = vsel %vm580_vm3, %v4113_v41, 0.0 }
0x1430   : > { %2195 = vadd.xlane.f32.xlu0 %v2194_v60 }
0x1446   : > { %2282 = vrot.lane.b32.xlu0 %v4568_v49, %s4312_s15 }
0x14b9   : > { %v2193_v43 = vpop.xlane.xlu0 %2192 }
0x14ba   : > { %4114 = vrcp.f32 %v2193_v43 }
0x14bd   : > { %v2196_v44 = vpop.xlane.xlu0 %2195 }
0x14be   : > { %4116 = vrcp.f32 %v2196_v44 }
0x14c1   : > { %v2283_v48 = vpop.permute.xlu0 %2282 }
0x14c4   : > { %v4115_v57 = vpop.eup %4114 }
0x14c5   : > { %v2199_v45 = vmul.f32 %v4115_v57, %v4111_v36 }
0x14c7   : > { %3584 = vmatprep.mubr.msk.f32.mxu1 %vm580_vm3, %v2199_v45 }
0x14c8   : > { %v4117_v46 = vpop.eup %4116 }
0x14c9   : > { %v2200_v47 = vmul.f32 %v4117_v46, %v4113_v41 }
0x14cb   : > { %3585 = vmatmul.mubr.msk.f32.vlgmr.msra.gmra.mrb[22].mxu1 %vm580_vm3, %v2200_v47 }
0x14cc   : > { %3799 = vmatpush3.bf16.xpose.msk.msra.mxu1 %vm4582_vm2, %v3794_v35  ;;  %3591 = vmatprep.mubr.msk.f32.mxu1 %vm494_vm1, %v2283_v48 }
0x14d3   : > { %3592 = vmatmul.mubr.msk.f32.vlgmr.msra.gmra.mrb[24].mxu1 %vm494_vm1, %v2285_v50 }
0x159e   : > { %v4814_v51 = vpop.f32.mrb[22].mxu1 }
0x159f   : > { %v4816_v52 = vpop.f32.mrb[23].mxu1 }
0x15a6   : > { %v3593_v55 = vpop.f32.mrb[24].mxu1 }
0x15a7   : > { %v2364_v58 = vpop.f32.mrb[25].mxu1  ;;  %v2376_v59 = vsel %vm580_vm3, %v3593_v55, -inf }
0x15a8   : > { %2377 = vmax.xlane.f32.xlu0 %v2376_v59  ;;  %v2373_v2 = vsel %vm580_vm3, %v2364_v58, -inf }
0x15a9   : > { %2374 = vmax.xlane.f32.xlu1 %v2373_v2 }
0x1635   : > { %v2378_v3 = vpop.xlane.xlu0 %2377 }
0x1636   : > { %v2380_v4 = vsub.f32 %v3593_v55, %v2378_v3  ;;  %v2375_v5 = vpop.xlane.xlu1 %2374 }
0x1637   : > { %v2379_v40 = vsub.f32 %v2364_v58, %v2375_v5 }
0x1638   : > { %v2383_v42 = vmul.f32 1.442695, %v2380_v4 }
0x1639   : > { %v2381_v6 = vmul.f32 1.442695, %v2379_v40 }
0x163a   : > { %4118 = vpow2.f32 %v2383_v42 }
0x163b   : > { %4120 = vpow2.f32 %v2381_v6 }
0x1644   : > { %v4119_v9 = vpop.eup %4118 }
0x1645   : > { %v4121_v10 = vpop.eup %4120  ;;  %v2388_v11 = vsel %vm580_vm3, %v4119_v9, 0.0 }
0x1646   : > { %2389 = vadd.xlane.f32.xlu1 %v2388_v11  ;;  %v2385_v12 = vsel %vm580_vm3, %v4121_v10, 0.0 }
0x1647   : > { %2386 = vadd.xlane.f32.xlu0 %v2385_v12 }
0x1657   : > { %4027 = vrot.lane.b32.xlu1 %v4574_v56, %s4321_s26 }
0x165b   : > { %2484 = vrot.lane.b32.xlu1 %v4568_v49, %s4317_s7 }
0x165d   : > { %4022 = vrot.lane.b32.xlu0 %v4620_v62, %s4311_s28 }
0x1661   : > { %2486 = vrot.lane.b32.xlu0 %v4590_v63, %s4317_s7 }
0x16d3   : > { %v2390_v13 = vpop.xlane.xlu1 %2389 }
0x16d4   : > { %4122 = vrcp.f32 %v2390_v13  ;;  %v2387_v18 = vpop.xlane.xlu0 %2386 }
0x16d5   : > { %4124 = vrcp.f32 %v2387_v18 }
0x16d7   : > { %v4028_v19 = vpop.permute.xlu1 %4027 }
0x16d8   : > { %v4023_v20 = vpop.permute.xlu0 %4022  ;;  %v4030_v21 = vunpack.i.h.bf16 %v4028_v19  ;;  %v4029_v22 = vunpack.i.l.bf16 %v4028_v19 }
0x16d9   : > { %v4025_v23 = vunpack.i.h.bf16 %v4023_v20  ;;  %v4024_v24 = vunpack.i.l.bf16 %v4023_v20 }
0x16da   : > { %v3804_v26 = vpack.c.bf16 %v4030_v21, %v4029_v22 }
0x16db   : > { %v3800_v25 = vpack.c.bf16 %v4025_v23, %v4024_v24  ;;  %v2485_v35 = vpop.permute.xlu1 %2484 }
0x16dc   : > { %v2487_v36 = vpop.permute.xlu0 %2486 }
0x16dd   : > { %3801 = vmatprep.subr.bf16.mxu0 %v3800_v25 }
0x16de   : > { %v4123_v27 = vpop.eup %4122  ;;  %3803 = vmatpush3.bf16.msra.mxu0 %v3800_v25 }
0x16df   : > { %v4125_v28 = vpop.eup %4124  ;;  %3806 = vmatprep.subr.msk.bf16.mxu0 %vm4582_vm2, %v3804_v26  ;;  %v2394_v32 = vmul.f32 %v4123_v27, %v4119_v9 }
0x16e0   : > { %v2393_v29 = vmul.f32 %v4125_v28, %v4121_v10 }
0x16e2   : > { %3598 = vmatprep.mubr.msk.f32.mxu0 %vm580_vm3, %v2393_v29 }
0x16e3   : > { %3599 = vmatmul.mubr.msk.f32.vlgmr.msra.gmra.mrb[18].mxu0 %vm580_vm3, %v2394_v32 }
0x16e4   : > { %3605 = vmatprep.mubr.msk.f32.mxu0 %vm494_vm1, %v2485_v35 }
0x16e7   : > { %3809 = vmatpush3.bf16.xpose.msk.msra.mxu0 %vm4582_vm2, %v3804_v26 }
0x16ee   : > { %3606 = vmatmul.mubr.msk.f32.vlgmr.msra.gmra.mrb[20].mxu0 %vm494_vm1, %v2487_v36 }
0x17b6   : > { %v4838_v39 = vpop.f32.mrb[18].mxu0 }
0x17b7   : > { %v4840_v41 = vpop.f32.mrb[19].mxu0 }
0x17c1   : > { %v3607_v60 = vpop.f32.mrb[20].mxu0 }
0x17c2   : > { %v2566_v43 = vpop.f32.mrb[21].mxu0  ;;  %v2578_v44 = vsel %vm580_vm3, %v3607_v60, -inf }
0x17c3   : > { %2579 = vmax.xlane.f32.xlu0 %v2578_v44  ;;  %v2575_v57 = vsel %vm580_vm3, %v2566_v43, -inf }
0x17c4   : > { %2576 = vmax.xlane.f32.xlu1 %v2575_v57  ;;  %v3009_v57 = vld [vmem:[#allocation7 + $0x30] sm:$0xff] }
0x1850   : > { %v2580_v45 = vpop.xlane.xlu0 %2579 }
0x1851   : > { %v2582_v46 = vsub.f32 %v3607_v60, %v2580_v45  ;;  %v2577_v47 = vpop.xlane.xlu1 %2576  ;;  %v3010_v45 = vld [vmem:[#allocation7 + $0x38] sm:$0xff] }
0x1852   : > { %v2581_v48 = vsub.f32 %v2566_v43, %v2577_v47  ;;  %v3011_v47 = vld [vmem:[#allocation7 + $0x40] sm:$0xff] }
0x1853   : > { %v2585_v50 = vmul.f32 1.442695, %v2582_v46  ;;  %v3836_v46 = vpack.c.bf16 %v3010_v45, %v3009_v57 }
0x1854   : > { %v2583_v55 = vmul.f32 1.442695, %v2581_v48  ;;  %v3012_v48 = vld [vmem:[#allocation7 + $0x48] sm:$0xff] }
0x1855   : > { %4126 = vpow2.f32 %v2585_v50  ;;  %v3840_v50 = vpack.c.bf16 %v3012_v48, %v3011_v47 }
0x1856   : > { %4128 = vpow2.f32 %v2583_v55  ;;  %v3013_v55 = vld [vmem:[#allocation7 + $0x50] sm:$0xff] }
0x185f   : > { %v4127_v58 = vpop.eup %4126 }
0x1860   : > { %v4129_v59 = vpop.eup %4128  ;;  %v2590_v2 = vsel %vm580_vm3, %v4127_v58, 0.0 }
0x1861   : > { %2591 = vadd.xlane.f32.xlu1 %v2590_v2  ;;  %v2587_v3 = vsel %vm580_vm3, %v4129_v59, 0.0 }
0x1862   : > { %2588 = vadd.xlane.f32.xlu0 %v2587_v3 }
0x1872   : > { %4037 = vrot.lane.b32.xlu1 %v4574_v56, %s4322_s6 }
0x1876   : > { %2684 = vrot.lane.b32.xlu1 %v4568_v49, %s4319_s14 }
0x1878   : > { %4032 = vrot.lane.b32.xlu0 %v4620_v62, %s4314_s30 }
0x187c   : > { %2686 = vrot.lane.b32.xlu0 %v4590_v63, %s4319_s14 }
0x18ee   : > { %v2592_v4 = vpop.xlane.xlu1 %2591 }
0x18ef   : > { %4130 = vrcp.f32 %v2592_v4  ;;  %v2589_v5 = vpop.xlane.xlu0 %2588 }
0x18f0   : > { %4132 = vrcp.f32 %v2589_v5 }
0x18f2   : > { %v4038_v40 = vpop.permute.xlu1 %4037 }
0x18f3   : > { %v4033_v42 = vpop.permute.xlu0 %4032  ;;  %v4040_v6 = vunpack.i.h.bf16 %v4038_v40  ;;  %v4039_v9 = vunpack.i.l.bf16 %v4038_v40 }
0x18f4   : > { %v4035_v10 = vunpack.i.h.bf16 %v4033_v42  ;;  %v4034_v11 = vunpack.i.l.bf16 %v4033_v42 }
0x18f5   : > { %v3814_v12 = vpack.c.bf16 %v4040_v6, %v4039_v9 }
0x18f6   : > { %v3810_v56 = vpack.c.bf16 %v4035_v10, %v4034_v11  ;;  %v2685_v19 = vpop.permute.xlu1 %2684 }
0x18f7   : > { %v2687_v20 = vpop.permute.xlu0 %2686 }
0x18f8   : > { %3811 = vmatprep.subr.bf16.mxu1 %v3810_v56 }
0x18f9   : > { %v4131_v49 = vpop.eup %4130  ;;  %3813 = vmatpush3.bf16.msra.mxu1 %v3810_v56 }
0x18fa   : > { %v4133_v13 = vpop.eup %4132  ;;  %3816 = vmatprep.subr.msk.bf16.mxu1 %vm4582_vm2, %v3814_v12  ;;  %v2596_v18 = vmul.f32 %v4131_v49, %v4127_v58  ;;  %v3014_v58 = vld [vmem:[#allocation7 + $0x58] sm:$0xff] }
0x18fb   : > { %v2595_v63 = vmul.f32 %v4133_v13, %v4129_v59  ;;  %v3844_v59 = vpack.c.bf16 %v3014_v58, %v3013_v55 }
0x18fd   : > { %3612 = vmatprep.mubr.msk.f32.mxu1 %vm580_vm3, %v2595_v63 }
0x18fe   : > { %3613 = vmatmul.mubr.msk.f32.vlgmr.msra.gmra.mrb[26].mxu1 %vm580_vm3, %v2596_v18 }
0x18ff   : > { %3619 = vmatprep.mubr.msk.f32.mxu1 %vm494_vm1, %v2685_v19 }
0x1902   : > { %3819 = vmatpush3.bf16.xpose.msk.msra.mxu1 %vm4582_vm2, %v3814_v12 }
0x1909   : > { %3620 = vmatmul.mubr.msk.f32.vlgmr.msra.gmra.mrb[28].mxu1 %vm494_vm1, %v2687_v20 }
0x19d1   : > { %v3614_v21 = vpop.f32.mrb[26].mxu1 }
0x19d2   : > { %v2675_v22 = vpop.f32.mrb[27].mxu1 }
0x19dc   : > { %v3621_v23 = vpop.f32.mrb[28].mxu1 }
0x19dd   : > { %v2766_v24 = vpop.f32.mrb[29].mxu1  ;;  %v2778_v25 = vsel %vm580_vm3, %v3621_v23, -inf }
0x19de   : > { %2779 = vmax.xlane.f32.xlu0 %v2778_v25  ;;  %v2775_v26 = vsel %vm580_vm3, %v2766_v24, -inf }
0x19df   : > { %2776 = vmax.xlane.f32.xlu1 %v2775_v26 }
0x1a6b   : > { %v2780_v27 = vpop.xlane.xlu0 %2779 }
0x1a6c   : > { %v2782_v28 = vsub.f32 %v3621_v23, %v2780_v27  ;;  %v2777_v29 = vpop.xlane.xlu1 %2776 }
0x1a6d   : > { %v2781_v32 = vsub.f32 %v2766_v24, %v2777_v29 }
0x1a6e   : > { %v2785_v35 = vmul.f32 1.442695, %v2782_v28 }
0x1a6f   : > { %v2783_v61 = vmul.f32 1.442695, %v2781_v32 }
0x1a70   : > { %4134 = vpow2.f32 %v2785_v35 }
0x1a71   : > { %4136 = vpow2.f32 %v2783_v61 }
0x1a7a   : > { %v4135_v36 = vpop.eup %4134 }
0x1a7b   : > { %v4137_v60 = vpop.eup %4136  ;;  %v2790_v43 = vsel %vm580_vm3, %v4135_v36, 0.0 }
0x1a7c   : > { %2791 = vadd.xlane.f32.xlu1 %v2790_v43  ;;  %v2787_v44 = vsel %vm580_vm3, %v4137_v60, 0.0 }
0x1a7d   : > { %2788 = vadd.xlane.f32.xlu0 %v2787_v44 }
0x1a8d   : > { %2886 = vrot.lane.b32.xlu1 %v4648_v31, %s4315_s11 }
0x1a91   : > { %2888 = vrot.lane.b32.xlu1 %v4646_v30, %s4315_s11 }
0x1a93   : > { %4042 = vrot.lane.b32.xlu0 %v4620_v62, %s4316_s23 }
0x1a95   : > { %2896 = vrot.lane.b32.xlu1 %v4670_v7, %s4313_s9 }
0x1a97   : > { %2894 = vrot.lane.b32.xlu0 %v4672_v8, %s4313_s9 }
0x1a99   : > { %2904 = vrot.lane.b32.xlu1 %v4694_v37, %s4310_s10 }
0x1a9b   : > { %2902 = vrot.lane.b32.xlu0 %v4696_v38, %s4310_s10 }
0x1a9d   : > { %2912 = vrot.lane.b32.xlu1 %v4718_v15, %s4308_s12 }
0x1a9f   : > { %2910 = vrot.lane.b32.xlu0 %v4720_v16, %s4308_s12 }
0x1aa1   : > { %2920 = vrot.lane.b32.xlu1 %v4742_v53, %s4319_s14 }
0x1aa3   : > { %2918 = vrot.lane.b32.xlu0 %v4744_v54, %s4319_s14  ;;  %v3003_v54 = vld [vmem:[#allocation7] sm:$0xff]  ;;  %s4232_s14 = sshll.u32 %s4323_s8, 4  ;;  %s4233_s14 = int_to_ptr.vmem [resolvable:$false] %s4232_s14 }
0x1aa5   : > { %2928 = vrot.lane.b32.xlu1 %v4768_v33, %s4317_s7  ;;  %v3004_v33 = vld [vmem:[#allocation7 + $0x8] sm:$0xff] }
0x1aa7   : > { %2926 = vrot.lane.b32.xlu0 %v4770_v34, %s4317_s7  ;;  %v3005_v34 = vld [vmem:[#allocation7 + $0x10] sm:$0xff]  ;;  %s3106_s7 = scalar_lea.sflag [#allocation4], %s4533_s17 }
0x1aa9   : > { %2936 = vrot.lane.b32.xlu1 %v4792_v14, %s4312_s15  ;;  %v3824_v14 = vpack.c.bf16 %v3004_v33, %v3003_v54  ;;  %v3300_v54 = vld [vmem:[%s4980_s4] ss:$0 sm:$0xff] }
0x1aab   : > { %2934 = vrot.lane.b32.xlu0 %v4794_v17, %s4312_s15  ;;  %v3006_v17 = vld [vmem:[#allocation7 + $0x18] sm:$0xff]  ;;  %s3309_s15 = sshll.u32 %s4376_s22, 8 }
0x1aac   : > { %s4929_s23 = scalar_lea.hbm %s4981_s5, %s3309_s15 }
0x1aad   : > { %2944 = vrot.lane.b32.xlu1 %v4814_v51, %s4309_s13  ;;  %v3828_v51 = vpack.c.bf16 %v3006_v17, %v3005_v34 }
0x1aaf   : > { %2942 = vrot.lane.b32.xlu0 %v4816_v52, %s4309_s13  ;;  %v3007_v52 = vld [vmem:[#allocation7 + $0x20] sm:$0xff]  ;;  %s4998_s13 = sshll.u32 %s4533_s17, 4 }
0x1ab0   : > { %s271_s10 = scalar_lea.vmem [#allocation8], %s4998_s13 }
0x1ab1   : > { %2952 = vrot.lane.b32.xlu1 %v4838_v39, %s4322_s6  ;;  %v3008_v39 = vld [vmem:[#allocation7 + $0x28] sm:$0xff]  ;;  %s3119_s28 = sshll.u32 %s271_s10, 4  ;;  %s4924_s28 = int_to_ptr.vmem [resolvable:$true] %s3119_s28 }
0x1ab2   : > { %s4228_s22 = scalar_lea.vmem %s4924_s28, 256  ;;  %p4235_p5 = scmp.lt.s32.totalorder %s4924_s28, %s4233_s14 }
0x1ab3   : > { %2950 = vrot.lane.b32.xlu0 %v4840_v41, %s4322_s6  ;;  %v3832_v41 = vpack.c.bf16 %v3008_v39, %v3007_v52  ;;  %p4229_p11 = scmp.ne.s32.totalorder %s4924_s28, %s4228_s22 }
0x1ab5   : > { %2960 = vrot.lane.b32.xlu1 %v3614_v21, %s4321_s26  ;;  %p4230_p1 = pnand %p4229_p11, %p4999_p0 }
0x1ab7   : > { %2958 = vrot.lane.b32.xlu0 %v2675_v22, %s4321_s26  ;;  %p4231_p3 = pneg %p4230_p1 }
0x1b09   : > { %v2792_v62 = vpop.xlane.xlu1 %2791 }
0x1b0a   : > { %4138 = vrcp.f32 %v2792_v62  ;;  %v2789_v30 = vpop.xlane.xlu0 %2788 }
0x1b0b   : > { %4140 = vrcp.f32 %v2789_v30 }
0x1b0d   : > { %v2887_v4 = vpop.permute.xlu1 %2886 }
0x1b0e   : > { %v4043_v31 = vpop.permute.xlu0 %4042  ;;  %v2972_v23 = vsel %vm494_vm1, %v4624_v1, %v2887_v4 }
0x1b0f   : > { %v4045_v7 = vunpack.i.h.bf16 %v4043_v31  ;;  %v4044_v8 = vunpack.i.l.bf16 %v4043_v31 }
0x1b11   : > { %v3820_v37 = vpack.c.bf16 %v4045_v7, %v4044_v8  ;;  %v2889_v5 = vpop.permute.xlu1 %2888 }
0x1b12   : > { %v2895_v42 = vpop.permute.xlu0 %2894  ;;  %v2973_v24 = vsel %vm494_vm1, %v4622_v0, %v2889_v5 }
0x1b13   : > { %3821 = vmatprep.subr.bf16.mxu0 %v3820_v37  ;;  %v2974_v25 = vsel %vm580_vm3, %v2972_v23, %v2895_v42 }
0x1b14   : > { %v4139_v38 = vpop.eup %4138  ;;  %3823 = vmatpush3.bf16.msra.mxu0 %v3820_v37 }
0x1b15   : > { %v4141_v15 = vpop.eup %4140  ;;  %v2796_v53 = vmul.f32 %v4139_v38, %v4135_v36  ;;  %3825 = vmatprep.subr.bf16.mxu0 %v3824_v14  ;;  %v2897_v40 = vpop.permute.xlu1 %2896 }
0x1b16   : > { %v2795_v16 = vmul.f32 %v4141_v15, %v4137_v60  ;;  %v2903_v9 = vpop.permute.xlu0 %2902  ;;  %v2975_v26 = vsel %vm580_vm3, %v2973_v24, %v2897_v40 }
0x1b17   : > { %v2977_v27 = vsel %vm2976_vm4, %v2974_v25, %v2903_v9 }
0x1b18   : > { %3626 = vmatprep.mubr.msk.f32.mxu0 %vm580_vm3, %v2795_v16 }
0x1b19   : > { %3627 = vmatmul.mubr.msk.f32.vlgmr.msra.gmra.mrb[22].mxu0 %vm580_vm3, %v2796_v53  ;;  %v2905_v6 = vpop.permute.xlu1 %2904 }
0x1b1a   : > { %3827 = vmatpush3.bf16.msra.mxu0 %v3824_v14  ;;  %v2911_v11 = vpop.permute.xlu0 %2910  ;;  %v2978_v28 = vsel %vm2976_vm4, %v2975_v26, %v2905_v6 }
0x1b1b   : > { %3829 = vmatprep.subr.bf16.mxu0 %v3828_v51  ;;  %v2980_v29 = vsel %vm2979_vm5, %v2977_v27, %v2911_v11 }
0x1b1d   : > { %v2913_v10 = vpop.permute.xlu1 %2912 }
0x1b1e   : > { %3831 = vmatpush3.bf16.msra.mxu0 %v3828_v51  ;;  %v2919_v12 = vpop.permute.xlu0 %2918  ;;  %v2981_v32 = vsel %vm2979_vm5, %v2978_v28, %v2913_v10 }
0x1b1f   : > { %3833 = vmatprep.subr.bf16.mxu0 %v3832_v41  ;;  %v2983_v35 = vsel %vm2982_vm6, %v2980_v29, %v2919_v12 }
0x1b21   : > { %v2921_v56 = vpop.permute.xlu1 %2920 }
0x1b22   : > { %3835 = vmatpush3.bf16.msra.mxu0 %v3832_v41  ;;  %v2927_v13 = vpop.permute.xlu0 %2926  ;;  %v2984_v36 = vsel %vm2982_vm6, %v2981_v32, %v2921_v56 }
0x1b23   : > { %3837 = vmatprep.subr.bf16.mxu0 %v3836_v46  ;;  %v2986_v1 = vsel %vm2985_vm7, %v2983_v35, %v2927_v13 }
0x1b25   : > { %v2929_v49 = vpop.permute.xlu1 %2928 }
0x1b26   : > { %3839 = vmatpush3.bf16.msra.mxu0 %v3836_v46  ;;  %v2935_v18 = vpop.permute.xlu0 %2934  ;;  %v2987_v43 = vsel %vm2985_vm7, %v2984_v36, %v2929_v49 }
0x1b27   : > { %3841 = vmatprep.subr.bf16.mxu0 %v3840_v50  ;;  %v2989_v0 = vsel %vm2988_vm8, %v2986_v1, %v2935_v18 }
0x1b29   : > { %v2937_v63 = vpop.permute.xlu1 %2936 }
0x1b2a   : > { %3843 = vmatpush3.bf16.msra.mxu0 %v3840_v50  ;;  %v2943_v20 = vpop.permute.xlu0 %2942  ;;  %v2990_v44 = vsel %vm2988_vm8, %v2987_v43, %v2937_v63 }
0x1b2b   : > { %3845 = vmatprep.subr.bf16.mxu0 %v3844_v59  ;;  %v2992_v62 = vsel %vm2991_vm9, %v2989_v0, %v2943_v20 }
0x1b2d   : > { %v2945_v19 = vpop.permute.xlu1 %2944 }
0x1b2e   : > { %3847 = vmatpush3.bf16.msra.mxu0 %v3844_v59  ;;  %v2951_v22 = vpop.permute.xlu0 %2950  ;;  %v2993_v30 = vsel %vm2991_vm9, %v2990_v44, %v2945_v19 }
0x1b2f   : > { %v2995_v31 = vsel %vm2994_vm10, %v2992_v62, %v2951_v22 }
0x1b31   : > { %v2953_v21 = vpop.permute.xlu1 %2952 }
0x1b32   : > { %v2959_v60 = vpop.permute.xlu0 %2958  ;;  %v2996_v8 = vsel %vm2994_vm10, %v2993_v30, %v2953_v21 }
0x1b33   : > { %v2998_v37 = vsel %vm2997_vm11, %v2995_v31, %v2959_v60 }
0x1b35   : > { %v2961_v61 = vpop.permute.xlu1 %2960 }
0x1b36   : > { %v2999_v15 = vsel %vm2997_vm11, %v2996_v8, %v2961_v61 }
0x1bec   : > { %v3628_v2 = vpop.f32.mrb[22].mxu0 }
0x1bed   : > { %2968 = vrot.lane.b32.xlu1 %v3628_v2, %s4320_s24  ;;  %v2875_v3 = vpop.f32.mrb[23].mxu0 }
0x1bee   : > { %2966 = vrot.lane.b32.xlu0 %v2875_v3, %s4320_s24  ;;  %s4234_s24 = scalar_lea.vmem %s4233_s14, 512 }
0x1bef   : > { %p4236_p9 = scmp.lt.s32.totalorder %s4234_s24, %s4228_s22 }
0x1bf1   : > { %p4237_p12 = por %p4236_p9, %p4235_p5 }
0x1bf3   : > { %p4238_p2 = pnand %p4237_p12, %p4231_p3 }
0x1c5f   : > { %v2969_v7 = vpop.permute.xlu1 %2968 }
0x1c60   : > { %v2967_v38 = vpop.permute.xlu0 %2966  ;;  %v3002_v53 = vsel %vm3000_vm12, %v2999_v15, %v2969_v7 }
0x1c61   : > { %v3001_v16 = vsel %vm3000_vm12, %v2998_v37, %v2967_v38 }
0x1c62   : > { %3653 = vmatprep.mubr.msk.f32.mxu0 %vm327_vm0, %v3001_v16 }
0x1c63   : > { %3654 = vmatmul.mubr.msk.f32.vlgmr.msra.gmra.mrb[24].mxu0 %vm327_vm0, %v3002_v53 }
0x1d36   : > { %v3655_v33 = vpop.f32.mrb[24].mxu0 }
0x1d37   : > { %v3100_v34 = vadd.f32 %v3655_v33, %v3300_v54  ;;  %v3094_v14 = vpop.f32.mrb[25].mxu0 }
0x1d38   : > { %v3095_v17 = vadd.f32 %v3300_v54, %v3094_v14 }
0x1d39   : > { %3104 = vst.msk [vmem:[%s271_s10 + $0x8] sm:$0xff] %vm327_vm0, %v3100_v34 }
0x1d3a   : > { %3103 = vst.msk [vmem:[%s271_s10] sm:$0xff] %vm327_vm0, %v3095_v17 }
0x1d3b   : > { %4241 = shalt.err (!%p4238_p2)
}
0x1d3c   : > { %s4242_s26 = scalar_lea.hbm %s4929_s23, 256  ;;  %s4246_s13 = scalar_lea.hbm %s4981_s5, 512 }
0x1d3d   : > { %p4243_p13 = scmp.ne.s32.totalorder %s4929_s23, %s4242_s26  ;;  %p4247_p4 = scmp.lt.u32.totalorder %s4929_s23, %s4981_s5 }
0x1d3e   : > { %p4248_p7 = scmp.lt.u32.totalorder %s4246_s13, %s4242_s26  ;;  %p4250_p11 = scmp.lt.u32.totalorder %s4242_s26, %s4929_s23 }
0x1d3f   : > { %p4244_p6 = pnand %p4243_p13, %p4999_p0 }
0x1d40   : > { %p4249_p8 = por %p4248_p7, %p4247_p4 }
0x1d41   : > { %p4245_p10 = pneg %p4244_p6 }
0x1d42   : > { %p4251_p1 = por %p4250_p11, %p4249_p8 }
0x1d44   : > { %p4252_p3 = pnand %p4251_p1, %p4245_p10 }
0x1d46   : > { %4255 = shalt.err (!%p4252_p3)
}
0x1d47   : > { %s4324_s9 = smov 128  }
0x1d48   : > { %3858 = dma.vmem_to_hbm [thread:$0]  (%p4999_p0), %s4924_s28, 256, %s4929_s23, %s3106_s7, %s4324_s9, %s4324_s9, %s4315_s11  }
0x1d49 PF: > { %s3134_s30 = sand.u32 1, %s4286_s18   ;;  %p5000_p5 = scmp.ne.s32.totalorder %s4987_s25, 0 }
0x1d4a   : > { %p5001_p9 = scmp.ge.s32.totalorder %s4298_s21, 2  ;;  %s3135_s22 = scalar_lea.sflag [#allocation4], %s3134_s30 }
0x1d4c   : > { %p3872_p12 = pnand %p5001_p9, %p5000_p5 }
0x1d4e   : > { %4281 = dma.done.wait (!%p3872_p12), %s3135_s22, 256  }
0x1d4f   : > { %4283 = vsyncadd (!%p3872_p12), %s3135_s22, 4294967040  ;;  %p19_p2 = scmp.ge.s32.totalorder %s4468_s16, 4   ;;  %s5002_s18 = smov %s4290_s19 }
0x1d50   : > { %s5003_s19 = smov %s4294_s20  ;;  %s5004_s20 = smov %s4477_s27 }
0x1d51   : > { %s5005_s21 = smov %s4468_s16  ;;  %21 = sbr.rel (!%p19_p2) target bundleno = 6 (0x6), region = 93 }
0x1d58   :  { %3140 = vsyncpa [#allocation3], 1 }
0x1d59   :  { %3142 = vsyncpa [#allocation3 + $0x1], 1 }
0x1d5a   :  { %3143 = vsyncpa [#allocation6], 1 }
0x1d5b   :  { %3144 = vsyncpa [#allocation4], 1 }
0x1d5c   :  { %3146 = vsyncpa [#allocation4 + $0x1], 1 }

</bundles_post_ra>
